<compile_context>
chip_gen: v6e
topology: v6e:2x2x1
jax: 0.10.0
libtpu: 0.0.40
codegen_flags: <defaults>
</compile_context>

<pallas_src>
import functools

import jax
import jax.numpy as jnp
from jax.experimental import pallas as pl
from jax.experimental.pallas import tpu as pltpu


def _largest_divisor_leq(n, target):
    """Largest divisor of n that is <= target (keeps the grid exact)."""
    t = max(1, min(n, target))
    while n % t:
        t -= 1
    return t


def _mha_kernel(xq_ref, xkv_ref, wq_ref, wk_ref, wv_ref, wp_ref,
                bq_ref, bk_ref, bv_ref, bp_ref, o_ref,
                q_scr, m_scr, l_scr, acc_scr,
                *, emb_size, num_heads):
    head_dim = emb_size // num_heads
    ki = pl.program_id(2)
    num_kv = pl.num_programs(2)
    compute_dtype = xq_ref.dtype          # bf16 or f32 (set by the wrapper)

    # NOTE: the reference scales by sqrt(emb_size), NOT sqrt(head_dim).
    inv_scale = 1.0 / (float(emb_size) ** 0.5)

    # ---- once per (batch, query-tile): project Q, reset accumulators ----
    @pl.when(ki == 0)
    def _init():
        xq = xq_ref[0]                                              # (TQ, E)
        q = jnp.dot(xq, wq_ref[...], preferred_element_type=jnp.float32)
        q = (q + bq_ref[0]) * inv_scale          # fold softmax scale into Q
        q = q.astype(compute_dtype)
        tq = q.shape[0]
        # (TQ, E) -> (H, TQ, D): heads become a batch dim for the MXU.
        q_scr[...] = jnp.transpose(q.reshape(tq, num_heads, head_dim),
                                   (1, 0, 2))
        m_scr[...] = jnp.full_like(m_scr, -jnp.inf)
        l_scr[...] = jnp.zeros_like(l_scr)
        acc_scr[...] = jnp.zeros_like(acc_scr)

    # ---- K / V projections for this key tile (lane-dense (TK,E)@(E,E)) ----
    xkv = xkv_ref[0]                                                # (TK, E)
    k = jnp.dot(xkv, wk_ref[...], preferred_element_type=jnp.float32) + bk_ref[0]
    v = jnp.dot(xkv, wv_ref[...], preferred_element_type=jnp.float32) + bv_ref[0]
    k = k.astype(compute_dtype)
    v = v.astype(compute_dtype)
    tk = k.shape[0]
    k3 = jnp.transpose(k.reshape(tk, num_heads, head_dim), (1, 0, 2))  # (H,TK,D)
    v3 = jnp.transpose(v.reshape(tk, num_heads, head_dim), (1, 0, 2))  # (H,TK,D)

    # ---- head-batched attention with online softmax (all f32 math) ----
    q3 = q_scr[...]                                                 # (H, TQ, D)
    energy = jnp.einsum("hqd,hkd->hqk", q3, k3,
                        preferred_element_type=jnp.float32)         # (H, TQ, TK)

    m_prev = m_scr[...]                                             # (H, TQ, 1)
    m_new = jnp.maximum(m_prev, jnp.max(energy, axis=-1, keepdims=True))
    alpha = jnp.exp(m_prev - m_new)
    p = jnp.exp(energy - m_new)                                     # (H, TQ, TK)
    l_scr[...] = alpha * l_scr[...] + jnp.sum(p, axis=-1, keepdims=True)
    acc_scr[...] = alpha * acc_scr[...] + jnp.einsum(
        "hqk,hkd->hqd", p.astype(compute_dtype), v3,
        preferred_element_type=jnp.float32)                         # (H, TQ, D)
    m_scr[...] = m_new
    # dropout on the attention weights: identity in eval mode.

    # ---- once per (batch, query-tile): normalize, merge heads, project ----
    @pl.when(ki == num_kv - 1)
    def _finalize():
        inv_l = pl.reciprocal(l_scr[...], approx=True)              # EUP slot
        out = acc_scr[...] * inv_l                                  # (H, TQ, D)
        tq = out.shape[1]
        out = jnp.transpose(out, (1, 0, 2)).reshape(tq, emb_size)   # (TQ, E)
        proj = jnp.dot(out.astype(wp_ref.dtype), wp_ref[...],
                       preferred_element_type=jnp.float32) + bp_ref[0]
        o_ref[0] = proj.astype(o_ref.dtype)                         # lane-dense store


def multi_head_attention(x, params, *, emb_size, num_heads,
                         q_tile=128, kv_tile=256,
                         compute_dtype=None, vmem_limit_bytes=None):
    """x: (B, N, E).  params: dict of (E,E) weights and (1,E) biases (f32).

    compute_dtype: optional dtype (e.g. jnp.bfloat16) for matmul inputs;
    accumulation and softmax math stay float32. Output keeps x.dtype.
    vmem_limit_bytes: optional explicit VMEM budget (recommended on v7x, where
    only 64 MiB is available, when running production tile sizes).
    """
    B, N, E = x.shape
    assert E == emb_size and E % num_heads == 0
    head_dim = E // num_heads

    out_dtype = x.dtype
    if compute_dtype is None:
        compute_dtype = x.dtype

    tq = _largest_divisor_leq(N, q_tile)
    tk = _largest_divisor_leq(N, kv_tile)
    grid = (B, N // tq, N // tk)

    xc = x.astype(compute_dtype)
    wq = params["wq"].astype(compute_dtype)
    wk = params["wk"].astype(compute_dtype)
    wv = params["wv"].astype(compute_dtype)
    wp = params["wp"].astype(compute_dtype)
    bq = params["bq"].astype(jnp.float32)
    bk = params["bk"].astype(jnp.float32)
    bv = params["bv"].astype(jnp.float32)
    bp = params["bp"].astype(jnp.float32)

    kernel = functools.partial(_mha_kernel, emb_size=emb_size,
                               num_heads=num_heads)

    # Grid-invariant tiles: single-buffered (no point double-buffering blocks
    # whose index_map never changes -> halves weight VMEM footprint).
    w_spec = pl.BlockSpec((E, E), lambda b, qi, ki: (0, 0),
                          pipeline_mode=pl.Buffered(1))
    b_spec = pl.BlockSpec((1, E), lambda b, qi, ki: (0, 0),
                          pipeline_mode=pl.Buffered(1))

    grid_spec = pltpu.PrefetchScalarGridSpec(
        num_scalar_prefetch=0,
        grid=grid,
        in_specs=[
            pl.BlockSpec((1, tq, E), lambda b, qi, ki: (b, qi, 0)),  # x rows -> Q
            pl.BlockSpec((1, tk, E), lambda b, qi, ki: (b, ki, 0)),  # x rows -> K,V
            w_spec, w_spec, w_spec, w_spec,                          # Wq Wk Wv Wp
            b_spec, b_spec, b_spec, b_spec,                          # bq bk bv bp
        ],
        out_specs=pl.BlockSpec((1, tq, E), lambda b, qi, ki: (b, qi, 0)),
        scratch_shapes=[
            pltpu.VMEM((num_heads, tq, head_dim), compute_dtype),    # Q (head-batched)
            pltpu.VMEM((num_heads, tq, 1), jnp.float32),             # running max
            pltpu.VMEM((num_heads, tq, 1), jnp.float32),             # running sum
            pltpu.VMEM((num_heads, tq, head_dim), jnp.float32),      # out accumulator
        ],
    )

    compiler_kwargs = dict(
        dimension_semantics=("parallel", "parallel", "arbitrary"))
    if vmem_limit_bytes is not None:
        compiler_kwargs["vmem_limit_bytes"] = vmem_limit_bytes

    return pl.pallas_call(
        kernel,
        out_shape=jax.ShapeDtypeStruct((B, N, E), out_dtype),
        grid_spec=grid_spec,
        compiler_params=pltpu.CompilerParams(**compiler_kwargs),
    )(xc, xc, wq, wk, wv, wp, bq, bk, bv, bp)


def _reference(x, params, emb_size, num_heads):
    """Pure-JAX reference mirroring the PyTorch forward (mask=None, eval)."""
    B, N, E = x.shape
    D = E // num_heads
    q = x @ params["wq"] + params["bq"][0]
    k = x @ params["wk"] + params["bk"][0]
    v = x @ params["wv"] + params["bv"][0]
    def split(t):  # b n (h d) -> b h n d
        return t.reshape(B, N, num_heads, D).transpose(0, 2, 1, 3)
    q, k, v = split(q), split(k), split(v)
    energy = jnp.einsum("bhqd,bhkd->bhqk", q, k)
    att = jax.nn.softmax(energy / (emb_size ** 0.5), axis=-1)
    out = jnp.einsum("bhal,bhlv->bhav", att, v)
    out = out.transpose(0, 2, 1, 3).reshape(B, N, E)
    return out @ params["wp"] + params["bp"][0]


def _init_params(key, emb_size):
    """Deterministic init matching nn.Linear's U(-1/sqrt(in), 1/sqrt(in))."""
    bound = 1.0 / (emb_size ** 0.5)
    keys = jax.random.split(key, 8)
    def u(k, shape):
        return jax.random.uniform(k, shape, jnp.float32, -bound, bound)
    return {
        "wq": u(keys[0], (emb_size, emb_size)),
        "wk": u(keys[1], (emb_size, emb_size)),
        "wv": u(keys[2], (emb_size, emb_size)),
        "wp": u(keys[3], (emb_size, emb_size)),
        "bq": u(keys[4], (1, emb_size)),
        "bk": u(keys[5], (1, emb_size)),
        "bv": u(keys[6], (1, emb_size)),
        "bp": u(keys[7], (1, emb_size)),
    }


if __name__ == "__main__":
    B, N, EMB, HEADS = 2, 32, 32, 4

    root = jax.random.PRNGKey(0)
    kx, kp = jax.random.split(root)
    x = jax.random.normal(kx, (B, N, EMB), dtype=jnp.float32)
    params = _init_params(kp, EMB)
    ref = _reference(x, params, EMB, HEADS)

    # f32 run with small tiles so the multi-step online-softmax grid path
    # (2 query tiles x 2 key tiles per batch element) is actually exercised.
    out = multi_head_attention(x, params, emb_size=EMB, num_heads=HEADS,
                               q_tile=16, kv_tile=16)
    out = jax.block_until_ready(out)
    assert out.shape == (B, N, EMB)
    assert jnp.allclose(out, ref, atol=2e-3, rtol=2e-3), "f32 kernel mismatch"

    # bf16 compute path (halved HBM/VMEM traffic, bf16 MXU rate); f32 accumulate.
    out_bf16 = multi_head_attention(x, params, emb_size=EMB, num_heads=HEADS,
                                    q_tile=16, kv_tile=16,
                                    compute_dtype=jnp.bfloat16)
    out_bf16 = jax.block_until_ready(out_bf16)
    assert jnp.allclose(out_bf16, ref, atol=5e-2, rtol=5e-2), "bf16 kernel mismatch"

    print("KERNEL_OK")
</pallas_src>

<mosaic_0001>
module attributes {stable_mosaic.version = 11 : i64} {
  func.func @_mha_kernel(%arg0: i32, %arg1: i32, %arg2: i32, %arg3: memref<1x16x32xf32, #tpu.memory_space<vmem>>, %arg4: memref<1x16x32xf32, #tpu.memory_space<vmem>>, %arg5: memref<32x32xf32, #tpu.memory_space<vmem>>, %arg6: memref<32x32xf32, #tpu.memory_space<vmem>>, %arg7: memref<32x32xf32, #tpu.memory_space<vmem>>, %arg8: memref<32x32xf32, #tpu.memory_space<vmem>>, %arg9: memref<1x32xf32, #tpu.memory_space<vmem>>, %arg10: memref<1x32xf32, #tpu.memory_space<vmem>>, %arg11: memref<1x32xf32, #tpu.memory_space<vmem>>, %arg12: memref<1x32xf32, #tpu.memory_space<vmem>>, %arg13: memref<1x16x32xf32, #tpu.memory_space<vmem>>, %arg14: memref<4x16x8xf32, #tpu.memory_space<vmem>>, %arg15: memref<4x16x1xf32, #tpu.memory_space<vmem>>, %arg16: memref<4x16x1xf32, #tpu.memory_space<vmem>>, %arg17: memref<4x16x8xf32, #tpu.memory_space<vmem>>) attributes {dimension_semantics = [#tpu.dimension_semantics<parallel>, #tpu.dimension_semantics<parallel>, #tpu.dimension_semantics<arbitrary>], iteration_bounds = array<i64: 2, 2, 2>, scalar_prefetch = 0 : i64, scratch_operands = 4 : i64, tpu.core_type = #tpu.core_type<tc>, window_params = [{transform_indices = @transform_0, window_bounds = array<i64: 1, 16, 32>}, {transform_indices = @transform_1, window_bounds = array<i64: 1, 16, 32>}, {pipeline_mode = #tpu.pipeline_mode<synchronous>, transform_indices = @transform_2, window_bounds = array<i64: 32, 32>}, {pipeline_mode = #tpu.pipeline_mode<synchronous>, transform_indices = @transform_3, window_bounds = array<i64: 32, 32>}, {pipeline_mode = #tpu.pipeline_mode<synchronous>, transform_indices = @transform_4, window_bounds = array<i64: 32, 32>}, {pipeline_mode = #tpu.pipeline_mode<synchronous>, transform_indices = @transform_5, window_bounds = array<i64: 32, 32>}, {pipeline_mode = #tpu.pipeline_mode<synchronous>, transform_indices = @transform_6, window_bounds = array<i64: 1, 32>}, {pipeline_mode = #tpu.pipeline_mode<synchronous>, transform_indices = @transform_7, window_bounds = array<i64: 1, 32>}, {pipeline_mode = #tpu.pipeline_mode<synchronous>, transform_indices = @transform_8, window_bounds = array<i64: 1, 32>}, {pipeline_mode = #tpu.pipeline_mode<synchronous>, transform_indices = @transform_9, window_bounds = array<i64: 1, 32>}, {transform_indices = @transform_10, window_bounds = array<i64: 1, 16, 32>}]} {
    %c0_i32 = arith.constant 0 : i32
    %0 = arith.cmpi eq, %arg2, %c0_i32 : i32
    %1 = arith.extui %0 : i1 to i32
    %c0_i32_0 = arith.constant 0 : i32
    %2 = arith.cmpi ne, %1, %c0_i32_0 : i32
    scf.if %2 {
      %c0_38 = arith.constant 0 : index
      %c0_39 = arith.constant 0 : index
      %c0_40 = arith.constant 0 : index
      %50 = vector.load %arg3[%c0_38, %c0_39, %c0_40] : memref<1x16x32xf32, #tpu.memory_space<vmem>>, vector<1x16x32xf32>
      %51 = vector.shape_cast %50 : vector<1x16x32xf32> to vector<16x32xf32>
      %c0_41 = arith.constant 0 : index
      %c0_42 = arith.constant 0 : index
      %52 = vector.load %arg5[%c0_41, %c0_42] : memref<32x32xf32, #tpu.memory_space<vmem>>, vector<32x32xf32>
      %cst_43 = arith.constant dense<0.000000e+00> : vector<16x32xf32>
      %53 = tpu.matmul %51, %52, %cst_43 {dimension_numbers = #tpu.dot_dimension_numbers<[1], [0], [0], [1], [0, 0, 1, 1], [], []>} : vector<16x32xf32>, vector<32x32xf32>, vector<16x32xf32> -> vector<16x32xf32>
      %c0_44 = arith.constant 0 : index
      %c0_45 = arith.constant 0 : index
      %54 = vector.load %arg9[%c0_44, %c0_45] : memref<1x32xf32, #tpu.memory_space<vmem>>, vector<1x32xf32>
      %55 = vector.shape_cast %54 : vector<1x32xf32> to vector<32xf32>
      %56 = vector.shape_cast %55 : vector<32xf32> to vector<1x32xf32>
      %57 = vector.broadcast %56 : vector<1x32xf32> to vector<16x32xf32>
      %58 = arith.addf %53, %57 : vector<16x32xf32>
      %cst_46 = arith.constant 0.176776692 : f32
      %59 = vector.broadcast %cst_46 : f32 to vector<16x32xf32>
      %60 = arith.mulf %58, %59 : vector<16x32xf32>
      %61 = vector.shape_cast %60 : vector<16x32xf32> to vector<16x4x8xf32>
      %62 = tpu.transpose %61, [1, 0, 2] : vector<16x4x8xf32> -> vector<4x16x8xf32>
      %c0_47 = arith.constant 0 : index
      %c0_48 = arith.constant 0 : index
      %c0_49 = arith.constant 0 : index
      %63 = vector.load %arg14[%c0_47, %c0_48, %c0_49] : memref<4x16x8xf32, #tpu.memory_space<vmem>>, vector<4x16x8xf32>
      tpu.vector_store %arg14[%c0_47, %c0_48, %c0_49], %62 {strides = array<i32>} : memref<4x16x8xf32, #tpu.memory_space<vmem>>, vector<4x16x8xf32>,
      %cst_50 = arith.constant 0xFF800000 : f32
      %64 = vector.broadcast %cst_50 : f32 to vector<4x16x1xf32>
      %c0_51 = arith.constant 0 : index
      %c0_52 = arith.constant 0 : index
      %c0_53 = arith.constant 0 : index
      %65 = vector.load %arg15[%c0_51, %c0_52, %c0_53] : memref<4x16x1xf32, #tpu.memory_space<vmem>>, vector<4x16x1xf32>
      tpu.vector_store %arg15[%c0_51, %c0_52, %c0_53], %64 {strides = array<i32>} : memref<4x16x1xf32, #tpu.memory_space<vmem>>, vector<4x16x1xf32>,
      %cst_54 = arith.constant 0.000000e+00 : f32
      %66 = vector.broadcast %cst_54 : f32 to vector<4x16x1xf32>
      %c0_55 = arith.constant 0 : index
      %c0_56 = arith.constant 0 : index
      %c0_57 = arith.constant 0 : index
      %67 = vector.load %arg16[%c0_55, %c0_56, %c0_57] : memref<4x16x1xf32, #tpu.memory_space<vmem>>, vector<4x16x1xf32>
      tpu.vector_store %arg16[%c0_55, %c0_56, %c0_57], %66 {strides = array<i32>} : memref<4x16x1xf32, #tpu.memory_space<vmem>>, vector<4x16x1xf32>,
      %cst_58 = arith.constant 0.000000e+00 : f32
      %68 = vector.broadcast %cst_58 : f32 to vector<4x16x8xf32>
      %c0_59 = arith.constant 0 : index
      %c0_60 = arith.constant 0 : index
      %c0_61 = arith.constant 0 : index
      %69 = vector.load %arg17[%c0_59, %c0_60, %c0_61] : memref<4x16x8xf32, #tpu.memory_space<vmem>>, vector<4x16x8xf32>
      tpu.vector_store %arg17[%c0_59, %c0_60, %c0_61], %68 {strides = array<i32>} : memref<4x16x8xf32, #tpu.memory_space<vmem>>, vector<4x16x8xf32>,
    } else {
    }
    %c0 = arith.constant 0 : index
    %c0_1 = arith.constant 0 : index
    %c0_2 = arith.constant 0 : index
    %3 = vector.load %arg4[%c0, %c0_1, %c0_2] : memref<1x16x32xf32, #tpu.memory_space<vmem>>, vector<1x16x32xf32>
    %4 = vector.shape_cast %3 : vector<1x16x32xf32> to vector<16x32xf32>
    %c0_3 = arith.constant 0 : index
    %c0_4 = arith.constant 0 : index
    %5 = vector.load %arg6[%c0_3, %c0_4] : memref<32x32xf32, #tpu.memory_space<vmem>>, vector<32x32xf32>
    %cst = arith.constant dense<0.000000e+00> : vector<16x32xf32>
    %6 = tpu.matmul %4, %5, %cst {dimension_numbers = #tpu.dot_dimension_numbers<[1], [0], [0], [1], [0, 0, 1, 1], [], []>} : vector<16x32xf32>, vector<32x32xf32>, vector<16x32xf32> -> vector<16x32xf32>
    %c0_5 = arith.constant 0 : index
    %c0_6 = arith.constant 0 : index
    %7 = vector.load %arg10[%c0_5, %c0_6] : memref<1x32xf32, #tpu.memory_space<vmem>>, vector<1x32xf32>
    %8 = vector.shape_cast %7 : vector<1x32xf32> to vector<32xf32>
    %9 = vector.shape_cast %8 : vector<32xf32> to vector<1x32xf32>
    %10 = vector.broadcast %9 : vector<1x32xf32> to vector<16x32xf32>
    %11 = arith.addf %6, %10 : vector<16x32xf32>
    %c0_7 = arith.constant 0 : index
    %c0_8 = arith.constant 0 : index
    %12 = vector.load %arg7[%c0_7, %c0_8] : memref<32x32xf32, #tpu.memory_space<vmem>>, vector<32x32xf32>
    %cst_9 = arith.constant dense<0.000000e+00> : vector<16x32xf32>
    %13 = tpu.matmul %4, %12, %cst_9 {dimension_numbers = #tpu.dot_dimension_numbers<[1], [0], [0], [1], [0, 0, 1, 1], [], []>} : vector<16x32xf32>, vector<32x32xf32>, vector<16x32xf32> -> vector<16x32xf32>
    %c0_10 = arith.constant 0 : index
    %c0_11 = arith.constant 0 : index
    %14 = vector.load %arg11[%c0_10, %c0_11] : memref<1x32xf32, #tpu.memory_space<vmem>>, vector<1x32xf32>
    %15 = vector.shape_cast %14 : vector<1x32xf32> to vector<32xf32>
    %16 = vector.shape_cast %15 : vector<32xf32> to vector<1x32xf32>
    %17 = vector.broadcast %16 : vector<1x32xf32> to vector<16x32xf32>
    %18 = arith.addf %13, %17 : vector<16x32xf32>
    %19 = vector.shape_cast %11 : vector<16x32xf32> to vector<16x4x8xf32>
    %20 = tpu.transpose %19, [1, 0, 2] : vector<16x4x8xf32> -> vector<4x16x8xf32>
    %21 = vector.shape_cast %18 : vector<16x32xf32> to vector<16x4x8xf32>
    %22 = tpu.transpose %21, [1, 0, 2] : vector<16x4x8xf32> -> vector<4x16x8xf32>
    %c0_12 = arith.constant 0 : index
    %c0_13 = arith.constant 0 : index
    %c0_14 = arith.constant 0 : index
    %23 = vector.load %arg14[%c0_12, %c0_13, %c0_14] : memref<4x16x8xf32, #tpu.memory_space<vmem>>, vector<4x16x8xf32>
    "tpu.trace_start"() <{level = 10 : i32, message = "hqd,hkd->hqk"}> : () -> ()
    %cst_15 = arith.constant dense<0.000000e+00> : vector<4x16x16xf32>
    %24 = tpu.matmul %23, %20, %cst_15 {dimension_numbers = #tpu.dot_dimension_numbers<[2], [2], [1], [1], [0, 0, 0, 1, 1, 1], [0], [0]>} : vector<4x16x8xf32>, vector<4x16x8xf32>, vector<4x16x16xf32> -> vector<4x16x16xf32>
    "tpu.trace_stop"() : () -> ()
    %c0_16 = arith.constant 0 : index
    %c0_17 = arith.constant 0 : index
    %c0_18 = arith.constant 0 : index
    %25 = vector.load %arg15[%c0_16, %c0_17, %c0_18] : memref<4x16x1xf32, #tpu.memory_space<vmem>>, vector<4x16x1xf32>
    %cst_19 = arith.constant dense<0xFF800000> : vector<4x16xf32>
    %26 = vector.multi_reduction <maximumf>, %24, %cst_19 [2] : vector<4x16x16xf32> to vector<4x16xf32>
    %27 = vector.shape_cast %26 : vector<4x16xf32> to vector<4x16x1xf32>
    %28 = arith.maximumf %25, %27 : vector<4x16x1xf32>
    %29 = arith.subf %25, %28 : vector<4x16x1xf32>
    %30 = math.exp %29 : vector<4x16x1xf32>
    %31 = vector.broadcast %28 : vector<4x16x1xf32> to vector<4x16x16xf32>
    %32 = arith.subf %24, %31 : vector<4x16x16xf32>
    %33 = math.exp %32 : vector<4x16x16xf32>
    %c0_20 = arith.constant 0 : index
    %c0_21 = arith.constant 0 : index
    %c0_22 = arith.constant 0 : index
    %34 = vector.load %arg16[%c0_20, %c0_21, %c0_22] : memref<4x16x1xf32, #tpu.memory_space<vmem>>, vector<4x16x1xf32>
    %35 = arith.mulf %30, %34 : vector<4x16x1xf32>
    %cst_23 = arith.constant dense<0.000000e+00> : vector<4x16xf32>
    %36 = vector.multi_reduction <add>, %33, %cst_23 [2] : vector<4x16x16xf32> to vector<4x16xf32>
    %37 = vector.shape_cast %36 : vector<4x16xf32> to vector<4x16x1xf32>
    %38 = arith.addf %35, %37 : vector<4x16x1xf32>
    %c0_24 = arith.constant 0 : index
    %c0_25 = arith.constant 0 : index
    %c0_26 = arith.constant 0 : index
    %39 = vector.load %arg16[%c0_24, %c0_25, %c0_26] : memref<4x16x1xf32, #tpu.memory_space<vmem>>, vector<4x16x1xf32>
    tpu.vector_store %arg16[%c0_24, %c0_25, %c0_26], %38 {strides = array<i32>} : memref<4x16x1xf32, #tpu.memory_space<vmem>>, vector<4x16x1xf32>,
    %c0_27 = arith.constant 0 : index
    %c0_28 = arith.constant 0 : index
    %c0_29 = arith.constant 0 : index
    %40 = vector.load %arg17[%c0_27, %c0_28, %c0_29] : memref<4x16x8xf32, #tpu.memory_space<vmem>>, vector<4x16x8xf32>
    %41 = vector.broadcast %30 : vector<4x16x1xf32> to vector<4x16x8xf32>
    %42 = arith.mulf %41, %40 : vector<4x16x8xf32>
    "tpu.trace_start"() <{level = 10 : i32, message = "hqk,hkd->hqd"}> : () -> ()
    %cst_30 = arith.constant dense<0.000000e+00> : vector<4x16x8xf32>
    %43 = tpu.matmul %33, %22, %cst_30 {dimension_numbers = #tpu.dot_dimension_numbers<[2], [1], [1], [2], [0, 0, 0, 1, 1, 2], [0], [0]>} : vector<4x16x16xf32>, vector<4x16x8xf32>, vector<4x16x8xf32> -> vector<4x16x8xf32>
    "tpu.trace_stop"() : () -> ()
    %44 = arith.addf %42, %43 : vector<4x16x8xf32>
    %c0_31 = arith.constant 0 : index
    %c0_32 = arith.constant 0 : index
    %c0_33 = arith.constant 0 : index
    %45 = vector.load %arg17[%c0_31, %c0_32, %c0_33] : memref<4x16x8xf32, #tpu.memory_space<vmem>>, vector<4x16x8xf32>
    tpu.vector_store %arg17[%c0_31, %c0_32, %c0_33], %44 {strides = array<i32>} : memref<4x16x8xf32, #tpu.memory_space<vmem>>, vector<4x16x8xf32>,
    %c0_34 = arith.constant 0 : index
    %c0_35 = arith.constant 0 : index
    %c0_36 = arith.constant 0 : index
    %46 = vector.load %arg15[%c0_34, %c0_35, %c0_36] : memref<4x16x1xf32, #tpu.memory_space<vmem>>, vector<4x16x1xf32>
    tpu.vector_store %arg15[%c0_34, %c0_35, %c0_36], %28 {strides = array<i32>} : memref<4x16x1xf32, #tpu.memory_space<vmem>>, vector<4x16x1xf32>,
    %c1_i32 = arith.constant 1 : i32
    %47 = arith.cmpi eq, %arg2, %c1_i32 : i32
    %48 = arith.extui %47 : i1 to i32
    %c0_i32_37 = arith.constant 0 : i32
    %49 = arith.cmpi ne, %48, %c0_i32_37 : i32
    scf.if %49 {
      %c0_38 = arith.constant 0 : index
      %c0_39 = arith.constant 0 : index
      %c0_40 = arith.constant 0 : index
      %50 = vector.load %arg16[%c0_38, %c0_39, %c0_40] : memref<4x16x1xf32, #tpu.memory_space<vmem>>, vector<4x16x1xf32>
      %51 = tpu.reciprocal %50 {approx = true} : vector<4x16x1xf32> -> vector<4x16x1xf32>
      %c0_41 = arith.constant 0 : index
      %c0_42 = arith.constant 0 : index
      %c0_43 = arith.constant 0 : index
      %52 = vector.load %arg17[%c0_41, %c0_42, %c0_43] : memref<4x16x8xf32, #tpu.memory_space<vmem>>, vector<4x16x8xf32>
      %53 = vector.broadcast %51 : vector<4x16x1xf32> to vector<4x16x8xf32>
      %54 = arith.mulf %52, %53 : vector<4x16x8xf32>
      %55 = tpu.transpose %54, [1, 0, 2] : vector<4x16x8xf32> -> vector<16x4x8xf32>
      %56 = vector.shape_cast %55 : vector<16x4x8xf32> to vector<16x32xf32>
      %c0_44 = arith.constant 0 : index
      %c0_45 = arith.constant 0 : index
      %57 = vector.load %arg8[%c0_44, %c0_45] : memref<32x32xf32, #tpu.memory_space<vmem>>, vector<32x32xf32>
      %cst_46 = arith.constant dense<0.000000e+00> : vector<16x32xf32>
      %58 = tpu.matmul %56, %57, %cst_46 {dimension_numbers = #tpu.dot_dimension_numbers<[1], [0], [0], [1], [0, 0, 1, 1], [], []>} : vector<16x32xf32>, vector<32x32xf32>, vector<16x32xf32> -> vector<16x32xf32>
      %c0_47 = arith.constant 0 : index
      %c0_48 = arith.constant 0 : index
      %59 = vector.load %arg12[%c0_47, %c0_48] : memref<1x32xf32, #tpu.memory_space<vmem>>, vector<1x32xf32>
      %60 = vector.shape_cast %59 : vector<1x32xf32> to vector<32xf32>
      %61 = vector.shape_cast %60 : vector<32xf32> to vector<1x32xf32>
      %62 = vector.broadcast %61 : vector<1x32xf32> to vector<16x32xf32>
      %63 = arith.addf %58, %62 : vector<16x32xf32>
      %c0_49 = arith.constant 0 : index
      %c0_50 = arith.constant 0 : index
      %c0_51 = arith.constant 0 : index
      %64 = vector.load %arg13[%c0_49, %c0_50, %c0_51] : memref<1x16x32xf32, #tpu.memory_space<vmem>>, vector<1x16x32xf32>
      %65 = vector.shape_cast %64 : vector<1x16x32xf32> to vector<16x32xf32>
      %66 = vector.shape_cast %63 : vector<16x32xf32> to vector<1x16x32xf32>
      tpu.vector_store %arg13[%c0_49, %c0_50, %c0_51], %66 {strides = array<i32>} : memref<1x16x32xf32, #tpu.memory_space<vmem>>, vector<1x16x32xf32>,
    } else {
    }
    return
  }
  func.func @transform_0(%arg0: i32, %arg1: i32, %arg2: i32) -> (i32, i32, i32) {
    %c0_i32 = arith.constant 0 : i32
    %c0_i32_0 = arith.constant 0 : i32
    return %arg0, %arg1, %c0_i32 : i32, i32, i32
  }
  func.func @transform_1(%arg0: i32, %arg1: i32, %arg2: i32) -> (i32, i32, i32) {
    %c0_i32 = arith.constant 0 : i32
    %c0_i32_0 = arith.constant 0 : i32
    return %arg0, %arg2, %c0_i32 : i32, i32, i32
  }
  func.func @transform_2(%arg0: i32, %arg1: i32, %arg2: i32) -> (i32, i32) {
    %c0_i32 = arith.constant 0 : i32
    %c0_i32_0 = arith.constant 0 : i32
    %c0_i32_1 = arith.constant 0 : i32
    return %c0_i32, %c0_i32_0 : i32, i32
  }
  func.func @transform_3(%arg0: i32, %arg1: i32, %arg2: i32) -> (i32, i32) {
    %c0_i32 = arith.constant 0 : i32
    %c0_i32_0 = arith.constant 0 : i32
    %c0_i32_1 = arith.constant 0 : i32
    return %c0_i32, %c0_i32_0 : i32, i32
  }
  func.func @transform_4(%arg0: i32, %arg1: i32, %arg2: i32) -> (i32, i32) {
    %c0_i32 = arith.constant 0 : i32
    %c0_i32_0 = arith.constant 0 : i32
    %c0_i32_1 = arith.constant 0 : i32
    return %c0_i32, %c0_i32_0 : i32, i32
  }
  func.func @transform_5(%arg0: i32, %arg1: i32, %arg2: i32) -> (i32, i32) {
    %c0_i32 = arith.constant 0 : i32
    %c0_i32_0 = arith.constant 0 : i32
    %c0_i32_1 = arith.constant 0 : i32
    return %c0_i32, %c0_i32_0 : i32, i32
  }
  func.func @transform_6(%arg0: i32, %arg1: i32, %arg2: i32) -> (i32, i32) {
    %c0_i32 = arith.constant 0 : i32
    %c0_i32_0 = arith.constant 0 : i32
    %c0_i32_1 = arith.constant 0 : i32
    return %c0_i32, %c0_i32_0 : i32, i32
  }
  func.func @transform_7(%arg0: i32, %arg1: i32, %arg2: i32) -> (i32, i32) {
    %c0_i32 = arith.constant 0 : i32
    %c0_i32_0 = arith.constant 0 : i32
    %c0_i32_1 = arith.constant 0 : i32
    return %c0_i32, %c0_i32_0 : i32, i32
  }
  func.func @transform_8(%arg0: i32, %arg1: i32, %arg2: i32) -> (i32, i32) {
    %c0_i32 = arith.constant 0 : i32
    %c0_i32_0 = arith.constant 0 : i32
    %c0_i32_1 = arith.constant 0 : i32
    return %c0_i32, %c0_i32_0 : i32, i32
  }
  func.func @transform_9(%arg0: i32, %arg1: i32, %arg2: i32) -> (i32, i32) {
    %c0_i32 = arith.constant 0 : i32
    %c0_i32_0 = arith.constant 0 : i32
    %c0_i32_1 = arith.constant 0 : i32
    return %c0_i32, %c0_i32_0 : i32, i32
  }
  func.func @transform_10(%arg0: i32, %arg1: i32, %arg2: i32) -> (i32, i32, i32) {
    %c0_i32 = arith.constant 0 : i32
    %c0_i32_0 = arith.constant 0 : i32
    return %arg0, %arg1, %c0_i32 : i32, i32, i32
  }
}

</mosaic_0001>

<bundles_post_ra>
// kernel: tpu_custom_call.1
= control target key start
LH: loop header
LB: loop body
LE: loop exit
PB: predicated region body
PF: predicated region fallthrough
CT: control target
= control target key end

     0   :  { %s4882_s0 = inlined_call_operand.hbm [shape: f32[2,32,32], index: 0, kind: input, shape index: {}]   ;;  %s4883_s1 = inlined_call_operand.hbm [shape: f32[2,32,32], index: 1, kind: input, shape index: {}]   ;;  %s4884_s2 = inlined_call_operand.hbm [shape: f32[32,32], index: 2, kind: input, shape index: {}]   ;;  %s4885_s3 = inlined_call_operand.hbm [shape: f32[32,32], index: 3, kind: input, shape index: {}]   ;;  %s4886_s4 = inlined_call_operand.hbm [shape: f32[32,32], index: 4, kind: input, shape index: {}]   ;;  %s4887_s5 = inlined_call_operand.hbm [shape: f32[32,32], index: 5, kind: input, shape index: {}]   ;;  %s4888_s6 = inlined_call_operand.vmem [shape: f32[1,32], index: 6, kind: input, shape index: {}]   ;;  %s4889_s7 = inlined_call_operand.vmem [shape: f32[1,32], index: 7, kind: input, shape index: {}]   ;;  %s4890_s8 = inlined_call_operand.vmem [shape: f32[1,32], index: 8, kind: input, shape index: {}]   ;;  %s4891_s9 = inlined_call_operand.vmem [shape: f32[1,32], index: 9, kind: input, shape index: {}]   ;;  %s4892_s10 = inlined_call_operand.hbm [shape: f32[2,32,32], index: 10, kind: output, shape index: {}]  }
   0x1   :  { %4910 = sst [smem:[#allocation34_spill]] %s4884_s2 }
   0x2   :  { %4911 = sst [smem:[#allocation35_spill]] %s4885_s3 }
   0x3   :  { %4912 = sst [smem:[#allocation36_spill]] %s4886_s4 }
   0x4   :  { %4913 = sst [smem:[#allocation37_spill]] %s4887_s5 }
   0x5   :  { %4914 = sst [smem:[#allocation38_spill]] %s4888_s6 }
   0x6   :  { %4915 = sst [smem:[#allocation39_spill]] %s4889_s7 }
   0x7   :  { %4916 = sst [smem:[#allocation40_spill]] %s4890_s8 }
   0x8   :  { %4917 = sst [smem:[#allocation41_spill]] %s4891_s9 }
   0x9   :  { %4918 = sst [smem:[#allocation42_spill]] %s4892_s10 }
   0xa   :  { %15 = vsyncpa [#allocation7], 0 }
   0xb   :  { %17 = vsyncpa [#allocation7 + $0x1], 0 }
   0xc   :  { %18 = vsyncpa [#allocation10], 0 }
   0xd   :  { %20 = vsyncpa [#allocation10 + $0x1], 0 }
   0xe   :  { %21 = vsyncpa [#allocation13], 0 }
   0xf   :  { %22 = vsyncpa [#allocation16], 0 }
  0x10   :  { %23 = vsyncpa [#allocation8], 0 }
  0x11   :  { %25 = vsyncpa [#allocation8 + $0x1], 0  ;;  %s4170_s13 = smov 0   ;;  %s4172_s14 = smov 0  }
  0x12   :  { %s4174_s15 = smov 0   ;;  %s4176_s16 = smov 0  }
  0x13   :  { %s4178_s17 = smov 0   ;;  %s4180_s18 = smov 0  }
  0x14   :  { %s4182_s19 = smov 0   ;;  %s4184_s20 = smov 0  }
  0x15   :  { %s4186_s21 = smov 0   ;;  %s4188_s22 = smov 0  }
  0x16   :  { %s4190_s23 = smov 0   ;;  %s4192_s24 = smov 0  }
  0x17   :  { %s4194_s25 = smov 0  }
  0x18 LB: > { %4919 = sst [smem:[#allocation24_spill]] %s4049_s16  ;;  %s4234_s26 = sadd.s32 4294967295, %s4085_s25   ;;  %s4085_s25 = sphi %s4194_s25, %s31_s25   ;;  %s4081_s24 = sphi %s4192_s24, %s4981_s24   ;;  %s4077_s23 = sphi %s4190_s23, %s4968_s23   ;;  %s4073_s22 = sphi %s4188_s22, %s4980_s22   ;;  %s4069_s21 = sphi %s4186_s21, %s4979_s21   ;;  %s4065_s20 = sphi %s4184_s20, %s4978_s20   ;;  %s4061_s19 = sphi %s4182_s19, %s4977_s19   ;;  %s4057_s18 = sphi %s4180_s18, %s4976_s18   ;;  %s4053_s17 = sphi %s4178_s17, %s4975_s17   ;;  %s4049_s16 = sphi %s4176_s16, %s4974_s16   ;;  %s4045_s15 = sphi %s4174_s15, %s4973_s15   ;;  %s4041_s14 = sphi %s4172_s14, %s4972_s14   ;;  %s4037_s13 = sphi %s4170_s13, %s4971_s13  }
  0x19   : > { %4920 = sst [smem:[#allocation25_spill]] %s4061_s19  ;;  %p100_p0 = scmp.ne.s32.totalorder %s4041_s14, %s4037_s13 }
  0x1a   : > { %4921 = sst [smem:[#allocation26_spill]] %s4065_s20  ;;  %p4896_p1 = scmp.eq.s32.totalorder %s4234_s26, 0 }
  0x1b   : > { %4922 = sst [smem:[#allocation27_spill]] %s4069_s21  ;;  %p294_p2 = scmp.eq.s32.totalorder %s4234_s26, 7 }
  0x1c   : > { %4923 = sst [smem:[#allocation28_spill]] %s4077_s23  ;;  %p3298_p3 = scmp.ge.s32.totalorder %s4085_s25, 1 }
  0x1d   : > { %p307_p4 = scmp.lt.s32.totalorder %s4085_s25, 9  ;;  %p4243_p5 = por %p100_p0, %p4896_p1 }
  0x1e   : > { %s4087_s29 = smov [#allocation11]   ;;  %s4088_s12 = smov [#allocation12]  }
  0x1f   : > { %s4924_s27 = scalar_select %p4243_p5, 1, 0 }
  0x20   : > { %p4247_p6 = pnand %p3298_p3, %p307_p4  ;;  %s319_s30 = sshll.u32 %s4087_s29, 4  ;;  %s320_s30 = int_to_ptr.vmem [resolvable:$true] %s319_s30 }
  0x21   : > { %4925 = sst [smem:[#allocation29_spill]] %s4924_s27  ;;  %s332_s13 = sshll.u32 %s4088_s12, 4  ;;  %s333_s13 = int_to_ptr.vmem [resolvable:$true] %s332_s13 }
  0x22   : > { %p3558_p7 = pneg %p4247_p6  ;;  %s3784_s10 = scalar_lea.vmem %s320_s30, 512 }
  0x23   : > { %p3785_p10 = scmp.ne.s32.totalorder %s320_s30, %s3784_s10  ;;  %p3792_p13 = scmp.lt.s32.totalorder %s320_s30, %s320_s30 }
  0x24   : > { %p4255_p8 = pnand %p3558_p7, %p4896_p1  ;;  %p3793_p0 = scmp.lt.s32.totalorder %s3784_s10, %s3784_s10 }
  0x26   : > { %p3775_p9 = pneg %p4255_p8  ;;  %p3794_p3 = por %p3793_p0, %p3792_p13 }
  0x28   : > { %p3787_p11 = pnand %p3785_p10, %p3775_p9 }
  0x2a   : > { %p3788_p12 = pneg %p3787_p11 }
  0x2c   : > { %p3795_p4 = pnand %p3794_p3, %p3788_p12 }
  0x2e   : > { %3798 = shalt.err (!%p3795_p4)
}
  0x2f   : > { %s4894_s29 = smov 128   ;;  %s4897_s21 = smov 8  }
  0x30   : > { %s4928_s2 = sld [smem:[#allocation34_spill]]  ;;  %s3810_s9 = scalar_lea.vmem %s333_s13, 512 }
  0x31   : > { %p3811_p7 = scmp.ne.s32.totalorder %s333_s13, %s3810_s9  ;;  %p3818_p12 = scmp.lt.s32.totalorder %s333_s13, %s333_s13 }
  0x32   : > { %p3819_p13 = scmp.lt.s32.totalorder %s3810_s9, %s3810_s9 }
  0x33   : > { %p3813_p10 = pnand %p3811_p7, %p3775_p9 }
  0x34   : > { %p3820_p0 = por %p3819_p13, %p3818_p12 }
  0x35   : > { %p3814_p11 = pneg %p3813_p10 }
  0x36   : > { %3561 = dma.hbm_to_vmem [thread:$0]  (!%p4255_p8), %s4928_s2, 512, %s320_s30, [#allocation10], %s4894_s29, %s4894_s29, %s4897_s21  }
  0x37   : > { %p3821_p3 = pnand %p3820_p0, %p3814_p11 }
  0x39   : > { %3824 = shalt.err (!%p3821_p3)
}
  0x3a   : > { %s4929_s3 = sld [smem:[#allocation35_spill]]  ;;  %s4091_s20 = smov [#allocation14]  }
  0x3b   : > { %s345_s30 = sshll.u32 %s4091_s20, 4  ;;  %s4092_s12 = smov [#allocation15]   ;;  %s346_s30 = int_to_ptr.vmem [resolvable:$true] %s345_s30 }
  0x3c   : > { %s358_s2 = sshll.u32 %s4092_s12, 4  ;;  %s3836_s7 = scalar_lea.vmem %s346_s30, 512  ;;  %s359_s2 = int_to_ptr.vmem [resolvable:$true] %s358_s2 }
  0x3d   : > { %p3837_p4 = scmp.ne.s32.totalorder %s346_s30, %s3836_s7  ;;  %p3844_p11 = scmp.lt.s32.totalorder %s346_s30, %s346_s30 }
  0x3e   : > { %p3845_p12 = scmp.lt.s32.totalorder %s3836_s7, %s3836_s7 }
  0x3f   : > { %p3839_p7 = pnand %p3837_p4, %p3775_p9 }
  0x40   : > { %3564 = dma.hbm_to_vmem [thread:$0]  (!%p4255_p8), %s4929_s3, 512, %s333_s13, [#allocation13], %s4894_s29, %s4894_s29, %s4897_s21  }
  0x41   : > { %p3840_p10 = pneg %p3839_p7  ;;  %p3846_p13 = por %p3845_p12, %p3844_p11 }
  0x43   : > { %p3847_p0 = pnand %p3846_p13, %p3840_p10 }
  0x45   : > { %3850 = shalt.err (!%p3847_p0)
}
  0x46   : > { %s4930_s4 = sld [smem:[#allocation36_spill]]  ;;  %s3862_s13 = scalar_lea.vmem %s359_s2, 512 }
  0x47   : > { %p3863_p3 = scmp.ne.s32.totalorder %s359_s2, %s3862_s13  ;;  %p3870_p11 = scmp.lt.s32.totalorder %s359_s2, %s359_s2 }
  0x48   : > { %p3871_p10 = scmp.lt.s32.totalorder %s3862_s13, %s3862_s13 }
  0x49   : > { %p3865_p4 = pnand %p3863_p3, %p3775_p9 }
  0x4a   : > { %p3872_p12 = por %p3871_p10, %p3870_p11 }
  0x4b   : > { %p3866_p7 = pneg %p3865_p4 }
  0x4c   : > { %3567 = dma.hbm_to_vmem [thread:$0]  (!%p4255_p8), %s4930_s4, 512, %s346_s30, [#allocation13], %s4894_s29, %s4894_s29, %s4897_s21  }
  0x4d   : > { %p3873_p13 = pnand %p3872_p12, %p3866_p7 }
  0x4f   : > { %3876 = shalt.err (!%p3873_p13)
}
  0x50   : > { %s4931_s5 = sld [smem:[#allocation37_spill]]  ;;  %s3297_s11 = sadd.s32 4294967294, %s4085_s25  }
  0x51   : > { %s43_s20 = sadd.s32 1, %s4073_s22  ;;  %s46_s30 = sadd.s32 1, %s4077_s23 }
  0x52   : > { %p44_p9 = scmp.ge.s32.totalorder %s43_s20, 2  ;;  %s50_s12 = sadd.s32 1, %s4081_s24 }
  0x53   : > { %s59_s8 = sadd.s32 1, %s4057_s18  ;;  %p66_p0 = scmp.ne.s32.totalorder %s4057_s18, %s4053_s17 }
  0x54   : > { %s4983_s20 = smov (%p44_p9, %s43_s20), 0  ;;  %s4985_s30 = smov (!%p44_p9, %s46_s30), %s4077_s23 }
  0x55   : > { %4932 = sst [smem:[#allocation30_spill]] %s4983_s20  ;;  %p4909_p3 = scmp.eq.s32.totalorder %s4085_s25, 0 }
  0x56   : > { %3570 = dma.hbm_to_vmem [thread:$0]  (!%p4255_p8), %s4931_s5, 512, %s359_s2, [#allocation16], %s4894_s29, %s4894_s29, %s4897_s21  }
  0x57   : > { %p72_p8 = scmp.ne.s32.totalorder %s4053_s17, %s4049_s16  ;;  %p48_p4 = scmp.ge.s32.totalorder %s4985_s30, 2 }
  0x58   : > { %s83_s2 = ssub.s32 %s4073_s22, %s4983_s20  ;;  %p4322_p7 = por %p4909_p3, %p66_p0 }
  0x59   : > { %p4331_p11 = por %p4896_p1, %p72_p8  ;;  %s4987_s30 = smov (%p48_p4, %s4985_s30), 0 }
  0x5a   : > { %4935 = sst [smem:[#allocation31_spill]] %s4987_s30  ;;  %s4989_s12 = smov (!%p48_p4, %s50_s12), %s4081_s24 }
  0x5b   : > { %s55_s7 = ssub.s32 %s4077_s23, %s4987_s30  ;;  %p4342_p10 = por %p294_p2, %p66_p0 }
  0x5c   : > { %p52_p12 = scmp.ge.s32.totalorder %s4989_s12, 2  ;;  %p300_p13 = scmp.eq.s32.totalorder %s3297_s11, 7 }
  0x5d   : > { %s4936_s10 = scalar_select %p4342_p10, 1, 0 }
  0x5e   : > { %p4908_p9 = scmp.lt.s32.totalorder %s4085_s25, 8  ;;  %s384_s29 = sand.u32 1, %s4057_s18  }
  0x5f   : > { %4937 = sst [smem:[#allocation32_spill]] %s4936_s10  ;;  %s4991_s12 = smov (%p52_p12, %s4989_s12), 0 }
  0x60   : > { %4938 = sst [smem:[#allocation33_spill]] %s4991_s12  ;;  %p4353_p1 = por %p300_p13, %p72_p8 }
  0x61   : > { %s54_s3 = ssub.s32 %s4081_s24, %s4991_s12  ;;  %s3304_s4 = sshll.u32 %s384_s29, 4 }
  0x62   : > { %s56_s5 = sor.u32 %s55_s7, %s54_s3  ;;  %s4359_s30 = sor.u32 %s83_s2, %s54_s3 }
  0x63   : > { %p57_p2 = scmp.eq.s32.totalorder %s56_s5, 0  ;;  %s3305_s11 = sshll.u32 %s4077_s23, 1 }
  0x64   : > { %s3306_s16 = sshll.u32 %s4081_s24, 2  ;;  %s388_s10 = scalar_lea.vmem [#allocation6], %s3304_s4 }
  0x65   : > { %s4364_s20 = scalar_select %p57_p2, %s4057_s18, %s59_s8  }
  0x66   : > { %s397_s6 = sshll.u32 %s388_s10, 4  ;;  %s394_s19 = sadd.s32 %s3306_s16, %s3305_s11  ;;  %s398_s6 = int_to_ptr.vmem [resolvable:$true] %s397_s6 }
  0x67   : > { %s3307_s27 = sshll.u32 %s394_s19, 7  ;;  %p4371_p8 = pnand %p4908_p9, %p4322_p7 }
  0x68   : > { %s396_s5 = scalar_lea.hbm %s4882_s0, %s3307_s27  ;;  %s3309_s7 = sshll.u32 %s4073_s22, 1 }
  0x69   : > { %s417_s8 = sadd.s32 %s3309_s7, %s3306_s16  ;;  %s385_s23 = scalar_lea.sflag [#allocation7], %s384_s29 }
  0x6a   : > { %p3879_p4 = pneg %p4371_p8  ;;  %s3890_s4 = scalar_lea.vmem %s398_s6, 256 }
  0x6b   : > { %p3891_p12 = scmp.ne.s32.totalorder %s398_s6, %s3890_s4  ;;  %s4093_s19 = smov [#allocation6]  }
  0x6c   : > { %s3895_s9 = sshll.u32 %s4093_s19, 4  ;;  %s3896_s9 = int_to_ptr.vmem [resolvable:$false] %s3895_s9 }
  0x6d   : > { %p3893_p13 = pnand %p3891_p12, %p3879_p4  ;;  %s3897_s10 = scalar_lea.vmem %s3896_s9, 512 }
  0x6e   : > { %p3898_p7 = scmp.lt.s32.totalorder %s398_s6, %s3896_s9  ;;  %p3899_p9 = scmp.lt.s32.totalorder %s3897_s10, %s3890_s4 }
  0x6f   : > { %p3894_p2 = pneg %p3893_p13 }
  0x70   : > { %p3900_p3 = por %p3899_p9, %p3898_p7 }
  0x72   : > { %p3901_p0 = pnand %p3900_p3, %p3894_p2 }
  0x74   : > { %3904 = shalt.err (!%p3901_p0)
}
  0x75   : > { %s4941_s27 = smov 8   ;;  %s4942_s16 = smov 128  }
  0x76   : > { %3574 = dma.hbm_to_vmem [thread:$0]  (!%p4371_p8), %s396_s5, 256, %s398_s6, %s385_s23, %s4942_s16, %s4942_s16, %s4941_s27  }
  0x77   : > { %s3311_s29 = sshll.u32 %s417_s8, 7  ;;  %s87_s11 = sadd.s32 1, %s4045_s15 }
  0x78   : > { %p94_p9 = scmp.ne.s32.totalorder %s4045_s15, %s4041_s14  ;;  %p4943_p3 = scmp.eq.s32.totalorder %s4359_s30, 0 }
  0x79   : > { %p4944_p0 = scmp.eq.s32.totalorder %s4085_s25, 0  ;;  %s407_s12 = sand.u32 1, %s4085_s25  }
  0x7a   : > { %s4392_s3 = scalar_select %p4943_p3, %s4045_s15, %s87_s11  }
  0x7b   : > { %p96_p4 = por %p94_p9, %p4944_p0  ;;  %s419_s4 = scalar_lea.hbm %s4883_s1, %s3311_s29 }
  0x7c   : > { %s409_s19 = sand.u32 1, %s4045_s15   ;;  %p4945_p12 = scmp.lt.s32.totalorder %s4085_s25, 8 }
  0x7d   : > { %s3308_s9 = sshll.u32 %s409_s19, 4  ;;  %s408_s30 = scalar_lea.sflag [#allocation10], %s407_s12 }
  0x7e   : > { %p4403_p13 = pnand %p4945_p12, %p96_p4  ;;  %s411_s6 = scalar_lea.vmem [#allocation9], %s3308_s9 }
  0x7f   : > { %s420_s23 = sshll.u32 %s411_s6, 4  ;;  %s4094_s8 = smov [#allocation9]   ;;  %s421_s23 = int_to_ptr.vmem [resolvable:$true] %s420_s23 }
  0x80   : > { %p3907_p8 = pneg %p4403_p13  ;;  %s3918_s5 = scalar_lea.vmem %s421_s23, 256 }
  0x81   : > { %p3919_p2 = scmp.ne.s32.totalorder %s421_s23, %s3918_s5  ;;  %s3923_s29 = sshll.u32 %s4094_s8, 4  ;;  %s3924_s29 = int_to_ptr.vmem [resolvable:$false] %s3923_s29 }
  0x82   : > { %s3925_s11 = scalar_lea.vmem %s3924_s29, 512  ;;  %p3926_p3 = scmp.lt.s32.totalorder %s421_s23, %s3924_s29 }
  0x83   : > { %p3921_p7 = pnand %p3919_p2, %p3907_p8  ;;  %p3927_p0 = scmp.lt.s32.totalorder %s3925_s11, %s3918_s5 }
  0x85   : > { %p3922_p9 = pneg %p3921_p7  ;;  %p3928_p4 = por %p3927_p0, %p3926_p3 }
  0x87   : > { %p3929_p12 = pnand %p3928_p4, %p3922_p9 }
  0x89   : > { %3932 = shalt.err (!%p3929_p12)
}
  0x8a   : > { %3577 = dma.hbm_to_vmem [thread:$0]  (!%p4403_p13), %s419_s4, 256, %s421_s23, %s408_s30, %s4942_s16, %s4942_s16, %s4941_s27  }
  0x8b   : > { %432 = sbr.rel (%p4247_p6) target bundleno = 2085 (0x825), region = 60  ;;  %s4417_s12 = sand.u32 (!%p4247_p6), 1, %s4053_s17  }
  0x8c   : > { %s3313_s2 = sshll.u32 (!%p4247_p6), %s4417_s12, 4  ;;  %s435_s7 = scalar_lea.sflag (!%p4247_p6), [#allocation7], %s4417_s12 }
  0x8d   : > { %s4421_s19 = scalar_lea.vmem (!%p4247_p6), [#allocation6], %s3313_s2 }
  0x90   : > { %4012 = dma.done.wait (%p4331_p11), %s435_s7, 256  }
  0x91   : > { %4014 = vsyncadd (%p4331_p11), %s435_s7, 4294967040  ;;  %s443_s28 = sand.u32 1, %s4234_s26   ;;  %s445_s16 = sand.u32 1, %s4041_s14  }
  0x92   : > { %s4429_s4 = sshll.u32 %s445_s16, 4  ;;  %s444_s9 = scalar_lea.sflag [#allocation10], %s443_s28 }
  0x93   : > { %s447_s10 = scalar_lea.vmem [#allocation9], %s4429_s4 }
  0x94   : > { %4016 = dma.done.wait (%p4243_p5), %s444_s9, 256  }
  0x95   : > { %4018 = vsyncadd (%p4243_p5), %s444_s9, 4294967040  ;;  %p4948_p6 = scmp.eq.s32.totalorder %s4234_s26, 0 }
  0x97   : > { %4020 = dma.done.wait (%p4948_p6), [#allocation10], 512   ;;  %p4949_p11 = pmov %p4948_p6 }
  0x98   : > { %p4950_p13 = pmov %p4948_p6 }
  0x99   : > { %4022 = vsyncadd (%p4949_p11), [#allocation10], 4294966784 }
  0x9a   : > { %4024 = dma.done.wait (%p4950_p13), [#allocation13], 1024   ;;  %p4951_p8 = pmov %p4948_p6 }
  0x9b   : > { %p4952_p2 = pmov %p4948_p6 }
  0x9c   : > { %4026 = vsyncadd (%p4951_p8), [#allocation13], 4294966272 }
  0x9d   : > { %4028 = dma.done.wait (%p4952_p2), [#allocation16], 512   ;;  %p4953_p7 = pmov %p4952_p2 }
  0x9e   : > { %s4448_s13 = scalar_lea.vmem [#allocation17], %s3313_s2  ;;  %s4954_s6 = sld [smem:[#allocation25_spill]] }
  0x9f   : > { %4030 = vsyncadd (%p4953_p7), [#allocation16], 4294966784 }
  0xa4   : > { %p3320_p5 = scmp.ne.s32.totalorder %s4954_s6, 0 }
  0xa5   : > { %s4955_s30 = sld [smem:[#allocation38_spill]] (!%p3320_p5)  ;;  %s4097_s5 = smov (!%p3320_p5), 112  }
  0xa6   : > { %511 = sbr.rel (%p3320_p5) target bundleno = 522 (0x20a), region = 88  ;;  %s4098_s8 = smov (!%p3320_p5), 120  }
  0xa7   : > { %s4099_s29 = smov (!%p3320_p5), 104  }
  0xab   : > { %v517_v0 = vld [vmem:[#allocation11 + $0x18] sm:$0xff]  ;;  %v516_v1 = vld [vmem:[#allocation11 + $0x10] sm:$0xff]  ;;  %vm525_vm0 = vcmask 261120   ;;  %v515_v3 = vld [vmem:[#allocation11 + $0x8] sm:$0xff]  ;;  %vm901_vm1 = vcmask 64512   ;;  %vm910_vm2 = vcmask 7168   ;;  %v634_v17 = vlaneseq }
  0xac   : > { %3436 = vmatprep.subr.mxu0 %v517_v0  ;;  %v512_v2 = vld [vmem:[%s4421_s19] sm:$0xff]  ;;  %v513_v5 = vld [vmem:[%s4421_s19 + $0x8] sm:$0xff]  ;;  %v4095_v7 = vmov -inf   ;;  %v4096_v9 = vmov 0.0   ;;  %v4100_v15 = vmov 1983009808  }
  0xad   : > { %3437 = vmatpush3.msra.mxu0 %v517_v0  ;;  %3444 = vmatprep.mubr.msk.f32.mxu0 %vm525_vm0, %v512_v2  ;;  %v514_v4 = vld [vmem:[#allocation11] sm:$0xff]  ;;  %911 = vst.msk [vmem:[#allocation3] sm:$0xff] %vm910_vm2, %v4095_v7  ;;  %912 = vst.msk [vmem:[#allocation3 + $0x8] sm:$0xff] %vm910_vm2, %v4095_v7  ;;  %v632_v16 = vunpack.c.l.s4 %v4100_v15  ;;  %v635_v21 = vshrl.u32 %v634_v17, 7  ;;  %v4101_v22 = vmov 1934713408  }
  0xae   : > { %3438 = vmatprep.subr.mxu0 %v516_v1  ;;  %v3321_v6 = vld [vmem:[%s4955_s30] ss:$0 sm:$0xff]  ;;  %913 = vst.msk [vmem:[#allocation3 + $0x10] sm:$0xff] %vm910_vm2, %v4095_v7  ;;  %914 = vst.msk [vmem:[#allocation3 + $0x18] sm:$0xff] %vm910_vm2, %v4095_v7  ;;  %v664_v23 = vunpack.c.l.s4 %v4101_v22 }
  0xaf   : > { %3439 = vmatpush3.msra.mxu0 %v516_v1  ;;  %915 = vst.msk [vmem:[#allocation3 + $0x20] sm:$0xff] %vm910_vm2, %v4095_v7  ;;  %916 = vst.msk [vmem:[#allocation3 + $0x28] sm:$0xff] %vm910_vm2, %v4095_v7  ;;  %v633_v20 = vunpack.c.0.s8 %v632_v16 }
  0xb0   : > { %3440 = vmatprep.subr.mxu0 %v515_v3  ;;  %917 = vst.msk [vmem:[#allocation3 + $0x30] sm:$0xff] %vm910_vm2, %v4095_v7  ;;  %918 = vst.msk [vmem:[#allocation3 + $0x38] sm:$0xff] %vm910_vm2, %v4095_v7  ;;  %v665_v29 = vunpack.c.0.s8 %v664_v23 }
  0xb1   : > { %3441 = vmatpush3.msra.mxu0 %v515_v3  ;;  %919 = vst.msk [vmem:[#allocation4] sm:$0xff] %vm910_vm2, %v4096_v9  ;;  %920 = vst.msk [vmem:[#allocation4 + $0x8] sm:$0xff] %vm910_vm2, %v4096_v9  ;;  %v636_v26 = vsub.s32 %v633_v20, %v635_v21 }
  0xb2   : > { %3442 = vmatprep.subr.mxu0 %v514_v4  ;;  %921 = vst.msk [vmem:[#allocation4 + $0x10] sm:$0xff] %vm910_vm2, %v4096_v9  ;;  %922 = vst.msk [vmem:[#allocation4 + $0x18] sm:$0xff] %vm910_vm2, %v4096_v9  ;;  %v668_v40 = vsub.s32 %v665_v29, %v635_v21 }
  0xb3   : > { %3443 = vmatpush3.msra.mxu0 %v514_v4  ;;  %923 = vst.msk [vmem:[#allocation4 + $0x20] sm:$0xff] %vm910_vm2, %v4096_v9  ;;  %924 = vst.msk [vmem:[#allocation4 + $0x28] sm:$0xff] %vm910_vm2, %v4096_v9 }
  0xb4   : > { %3445 = vmatmul.mubr.msk.f32.vlgmr.msra.gmra.mxu0 %vm525_vm0, %v513_v5  ;;  %925 = vst.msk [vmem:[#allocation4 + $0x30] sm:$0xff] %vm910_vm2, %v4096_v9  ;;  %926 = vst.msk [vmem:[#allocation4 + $0x38] sm:$0xff] %vm910_vm2, %v4096_v9 }
  0xb5   : > { %927 = vst.msk [vmem:[#allocation5] sm:$0xff] %vm901_vm1, %v4096_v9  ;;  %928 = vst.msk [vmem:[#allocation5 + $0x8] sm:$0xff] %vm901_vm1, %v4096_v9 }
  0xb6   : > { %929 = vst.msk [vmem:[#allocation5 + $0x10] sm:$0xff] %vm901_vm1, %v4096_v9  ;;  %930 = vst.msk [vmem:[#allocation5 + $0x18] sm:$0xff] %vm901_vm1, %v4096_v9 }
  0xb7   : > { %931 = vst.msk [vmem:[#allocation5 + $0x20] sm:$0xff] %vm901_vm1, %v4096_v9  ;;  %932 = vst.msk [vmem:[#allocation5 + $0x28] sm:$0xff] %vm901_vm1, %v4096_v9 }
  0xb8   : > { %933 = vst.msk [vmem:[#allocation5 + $0x30] sm:$0xff] %vm901_vm1, %v4096_v9  ;;  %934 = vst.msk [vmem:[#allocation5 + $0x38] sm:$0xff] %vm901_vm1, %v4096_v9 }
 0x174   : > { %v3446_v8 = vpop.f32.mrf.mxu0 }
 0x175   : > { %v604_v10 = vadd.f32 %v3446_v8, %v3321_v6 }
 0x176   : > { %v598_v11 = vpop.f32.mrf.mxu0 }
 0x177   : > { %v608_v12 = vmul.f32 0.17677669, %v604_v10  ;;  %v599_v13 = vadd.f32 %v3321_v6, %v598_v11 }
 0x179   : > { %619 = vrot.lane.b32.xlu1 %v608_v12, %s4097_s5  ;;  %613 = vrot.lane.b32.xlu0 %v608_v12, %s4098_s8  ;;  %v607_v14 = vmul.f32 0.17677669, %v599_v13 }
 0x17d   : > { %617 = vrot.lane.b32.xlu1 %v607_v14, %s4097_s5  ;;  %611 = vrot.lane.b32.xlu0 %v607_v14, %s4098_s8 }
 0x181   : > { %625 = vrot.lane.b32.xlu1 %v608_v12, %s4099_s29  ;;  %623 = vrot.lane.b32.xlu0 %v607_v14, %s4099_s29 }
 0x1eb   : > { %v620_v18 = vpop.permute.xlu1 %619  ;;  %v614_v19 = vpop.permute.xlu0 %613 }
 0x1ec   : > { %v697_v27 = vcombine.low %v608_v12, %v620_v18  ;;  %v698_v28 = vcombine.high %v608_v12, %v620_v18 }
 0x1ee   : > { %v705_v38 = vrot.slane %v697_v27, %v636_v26  ;;  %v712_v39 = vrot.slane %v698_v28, %v636_v26 }
 0x1ef   : > { %v618_v24 = vpop.permute.xlu1 %617  ;;  %v612_v25 = vpop.permute.xlu0 %611 }
 0x1f0   : > { %v629_v30 = vcombine.low %v607_v14, %v618_v24  ;;  %v630_v31 = vcombine.high %v607_v14, %v618_v24 }
 0x1f2   : > { %v637_v45 = vrot.slane %v629_v30, %v636_v26  ;;  %v644_v46 = vrot.slane %v630_v31, %v636_v26 }
 0x1f3   : > { %v626_v32 = vpop.permute.xlu1 %625  ;;  %v624_v33 = vpop.permute.xlu0 %623 }
 0x1f4   : > { %v713_v34 = vcombine.low %v614_v19, %v626_v32  ;;  %v714_v35 = vcombine.high %v614_v19, %v626_v32  ;;  %v645_v36 = vcombine.low %v612_v25, %v624_v33  ;;  %v646_v37 = vcombine.high %v612_v25, %v624_v33 }
 0x1f6   : > { %v721_v41 = vrot.slane %v713_v34, %v636_v26  ;;  %v728_v42 = vrot.slane %v714_v35, %v636_v26  ;;  %v653_v43 = vrot.slane %v645_v36, %v636_v26  ;;  %v660_v44 = vrot.slane %v646_v37, %v636_v26 }
 0x1f8   : > { %v729_v47 = vcombine.low %v705_v38, %v721_v41  ;;  %v730_v48 = vcombine.high %v705_v38, %v721_v41  ;;  %v745_v49 = vcombine.low %v712_v39, %v728_v42  ;;  %v746_v50 = vcombine.high %v712_v39, %v728_v42 }
 0x1f9   : > { %v661_v51 = vcombine.low %v637_v45, %v653_v43  ;;  %v662_v52 = vcombine.high %v637_v45, %v653_v43  ;;  %v677_v53 = vcombine.low %v644_v46, %v660_v44  ;;  %v678_v54 = vcombine.high %v644_v46, %v660_v44 }
 0x1fa   : > { %v737_v55 = vrot.slane %v729_v47, %v668_v40  ;;  %v744_v56 = vrot.slane %v730_v48, %v668_v40  ;;  %v753_v57 = vrot.slane %v745_v49, %v668_v40  ;;  %v760_v58 = vrot.slane %v746_v50, %v668_v40 }
 0x1fb   : > { %v669_v59 = vrot.slane %v661_v51, %v668_v40  ;;  %v676_v60 = vrot.slane %v662_v52, %v668_v40  ;;  %v685_v61 = vrot.slane %v677_v53, %v668_v40  ;;  %v692_v62 = vrot.slane %v678_v54, %v668_v40 }
 0x1fc   : > { %v833_v63 = vcombine.low %v737_v55, %v744_v56  ;;  %v3326_v0 = vcombine.high %v737_v55, %v744_v56  ;;  %v849_v1 = vcombine.low %v753_v57, %v760_v58  ;;  %v3327_v2 = vcombine.high %v753_v57, %v760_v58 }
 0x1fd   : > { %v765_v3 = vcombine.low %v669_v59, %v676_v60  ;;  %v3324_v4 = vcombine.high %v669_v59, %v676_v60  ;;  %v781_v5 = vcombine.low %v685_v61, %v692_v62  ;;  %v3325_v6 = vcombine.high %v685_v61, %v692_v62 }
 0x1fe   : > { %v840_v7 = vrot.slane %v833_v63, %v636_v26  ;;  %v848_v8 = vrot.slane %v3326_v0, %v636_v26  ;;  %v856_v9 = vrot.slane %v849_v1, %v636_v26  ;;  %v864_v10 = vrot.slane %v3327_v2, %v636_v26 }
 0x1ff   : > { %v772_v11 = vrot.slane %v765_v3, %v636_v26  ;;  %v780_v12 = vrot.slane %v3324_v4, %v636_v26  ;;  %v788_v13 = vrot.slane %v781_v5, %v636_v26  ;;  %v796_v14 = vrot.slane %v3325_v6, %v636_v26 }
 0x200   : > { %v865_v15 = vcombine.low %v840_v7, %v848_v8  ;;  %v866_v16 = vcombine.high %v840_v7, %v848_v8  ;;  %v881_v17 = vcombine.low %v856_v9, %v864_v10  ;;  %v882_v18 = vcombine.high %v856_v9, %v864_v10 }
 0x201   : > { %v797_v19 = vcombine.low %v772_v11, %v780_v12  ;;  %v798_v20 = vcombine.high %v772_v11, %v780_v12  ;;  %v813_v21 = vcombine.low %v788_v13, %v796_v14  ;;  %v814_v22 = vcombine.high %v788_v13, %v796_v14 }
 0x202   : > { %v873_v23 = vrot.slane %v865_v15, %v668_v40  ;;  %v880_v24 = vrot.slane %v866_v16, %v668_v40  ;;  %v889_v25 = vrot.slane %v881_v17, %v668_v40  ;;  %v896_v27 = vrot.slane %v882_v18, %v668_v40 }
 0x203   : > { %v805_v28 = vrot.slane %v797_v19, %v668_v40  ;;  %v812_v29 = vrot.slane %v798_v20, %v668_v40  ;;  %v821_v30 = vrot.slane %v813_v21, %v668_v40  ;;  %v828_v31 = vrot.slane %v814_v22, %v668_v40 }
 0x204   : > { %v897_v32 = vcombine.low %v873_v23, %v889_v25  ;;  %v898_v33 = vcombine.high %v873_v23, %v889_v25  ;;  %v899_v34 = vcombine.low %v880_v24, %v896_v27  ;;  %v900_v26 = vcombine.high %v880_v24, %v896_v27 }
 0x205   : > { %v829_v35 = vcombine.low %v805_v28, %v821_v30  ;;  %v830_v36 = vcombine.high %v805_v28, %v821_v30  ;;  %v831_v37 = vcombine.low %v812_v29, %v828_v31  ;;  %v832_v38 = vcombine.high %v812_v29, %v828_v31 }
 0x206   : > { %903 = vst.msk [vmem:[#allocation2 + $0x8] sm:$0xff] %vm901_vm1, %v897_v32  ;;  %905 = vst.msk [vmem:[#allocation2 + $0x18] sm:$0xff] %vm901_vm1, %v898_v33 }
 0x207   : > { %907 = vst.msk [vmem:[#allocation2 + $0x28] sm:$0xff] %vm901_vm1, %v899_v34  ;;  %909 = vst.msk [vmem:[#allocation2 + $0x38] sm:$0xff] %vm901_vm1, %v900_v26 }
 0x208   : > { %902 = vst.msk [vmem:[#allocation2] sm:$0xff] %vm901_vm1, %v829_v35  ;;  %904 = vst.msk [vmem:[#allocation2 + $0x10] sm:$0xff] %vm901_vm1, %v830_v36 }
 0x209   : > { %906 = vst.msk [vmem:[#allocation2 + $0x20] sm:$0xff] %vm901_vm1, %v831_v37  ;;  %908 = vst.msk [vmem:[#allocation2 + $0x30] sm:$0xff] %vm901_vm1, %v832_v38 }
 0x20a PF: > { %v940_v39 = vld [vmem:[#allocation12 + $0x18] sm:$0xff]  ;;  %v939_v40 = vld [vmem:[#allocation12 + $0x10] sm:$0xff]  ;;  %vm948_vm3 = vcmask 261120   ;;  %v938_v42 = vld [vmem:[#allocation12 + $0x8] sm:$0xff]  ;;  %s4956_s7 = sld [smem:[#allocation39_spill]]  ;;  %s4102_s19 = smov 104   ;;  %v1141_v58 = vlaneseq }
 0x20b   : > { %3447 = vmatprep.subr.mxu0 %v940_v39  ;;  %v935_v41 = vld [vmem:[%s447_s10] sm:$0xff]  ;;  %v936_v44 = vld [vmem:[%s447_s10 + $0x8] sm:$0xff]  ;;  %s4103_s27 = smov 120   ;;  %s4104_s28 = smov 112   ;;  %vm1708_vm4 = vcmask 64512   ;;  %vm2065_vm5 = vcmask 130048  }
 0x20c   : > { %3448 = vmatpush3.msra.mxu0 %v940_v39  ;;  %3455 = vmatprep.mubr.msk.f32.mxu0 %vm948_vm3, %v935_v41  ;;  %v937_v43 = vld [vmem:[#allocation12] sm:$0xff]  ;;  %v1033_v49 = vld [vmem:[#allocation14 + $0x18] sm:$0xff]  ;;  %v1032_v51 = vld [vmem:[#allocation14 + $0x10] sm:$0xff]  ;;  %v4105_v56 = vmov 1983009808   ;;  %v1142_v62 = vshrl.u32 %v1141_v58, 7 }
 0x20d   : > { %3449 = vmatprep.subr.mxu0 %v939_v40  ;;  %3466 = vmatprep.mubr.msk.f32.mxu1 %vm948_vm3, %v935_v41  ;;  %v1031_v52 = vld [vmem:[#allocation14 + $0x8] sm:$0xff]  ;;  %v1030_v53 = vld [vmem:[#allocation14] sm:$0xff]  ;;  %v1139_v57 = vunpack.c.l.s4 %v4105_v56  ;;  %v4106_v59 = vmov 1934713408   ;;  %s4957_s9 = sld [smem:[#allocation40_spill]]  ;;  %vm2234_vm6 = vcmask 7168  }
 0x20e   : > { %3450 = vmatpush3.msra.mxu0 %v939_v40  ;;  %3458 = vmatprep.subr.mxu1 %v1033_v49  ;;  %v1171_v60 = vunpack.c.l.s4 %v4106_v59  ;;  %s4958_s10 = sld [smem:[#allocation25_spill]] }
 0x20f   : > { %3451 = vmatprep.subr.mxu0 %v938_v42  ;;  %3459 = vmatpush3.msra.mxu1 %v1033_v49  ;;  %v1700_v54 = vld [vmem:[#allocation2] sm:$0xff]  ;;  %v1702_v55 = vld [vmem:[#allocation2 + $0x10] sm:$0xff]  ;;  %v1140_v61 = vunpack.c.0.s8 %v1139_v57 }
 0x210   : > { %3452 = vmatpush3.msra.mxu0 %v938_v42  ;;  %v3328_v45 = vld [vmem:[%s4956_s7] ss:$0 sm:$0xff]  ;;  %3460 = vmatprep.subr.mxu1 %v1032_v51  ;;  %v1172_v1 = vunpack.c.0.s8 %v1171_v60 }
 0x211   : > { %3453 = vmatprep.subr.mxu0 %v937_v43  ;;  %3461 = vmatpush3.msra.mxu1 %v1032_v51  ;;  %v4507_v2 = vsub.s32 %v1140_v61, %v1142_v62 }
 0x212   : > { %3454 = vmatpush3.msra.mxu0 %v937_v43  ;;  %3462 = vmatprep.subr.mxu1 %v1031_v52  ;;  %v4509_v9 = vsub.s32 %v1172_v1, %v1142_v62 }
 0x213   : > { %3456 = vmatmul.mubr.msk.f32.vlgmr.msra.gmra.mxu0 %vm948_vm3, %v936_v44  ;;  %3463 = vmatpush3.msra.mxu1 %v1031_v52 }
 0x214   : > { %3464 = vmatprep.subr.mxu1 %v1030_v53  ;;  %3473 = vmatprep.mubr.msk.f32.mxu0 %vm1708_vm4, %v1700_v54  ;;  %p3366_p9 = scmp.ne.s32.totalorder %s4958_s10, 1 }
 0x215   : > { %3465 = vmatpush3.msra.mxu1 %v1030_v53  ;;  %s4109_s6 = smov (!%p3366_p9), 8   ;;  %s4110_s26 = smov (!%p3366_p9), 16  }
 0x216   : > { %3467 = vmatmul.mubr.msk.f32.vlgmr.msra.gmra.mxu1 %vm948_vm3, %v936_v44  ;;  %s4111_s23 = smov (!%p3366_p9), 24   ;;  %s4959_s8 = sld [smem:[#allocation41_spill]] (!%p3366_p9) }
 0x217   : > { %3480 = vmatprep.mubr.msk.f32.mxu1 %vm1708_vm4, %v1702_v55 }
 0x2d3   : > { %v3457_v46 = vpop.f32.mrf.mxu0 }
 0x2d4   : > { %v1027_v47 = vadd.f32 %v3457_v46, %v3328_v45 }
 0x2d5   : > { %v1021_v48 = vpop.f32.mrf.mxu0 }
 0x2d6   : > { %1132 = vrot.lane.b32.xlu1 %v1027_v47, %s4102_s19  ;;  %1120 = vrot.lane.b32.xlu0 %v1027_v47, %s4103_s27  ;;  %v1022_v50 = vadd.f32 %v3328_v45, %v1021_v48 }
 0x2da   : > { %1126 = vrot.lane.b32.xlu0 %v1027_v47, %s4104_s28  ;;  %1118 = vrot.lane.b32.xlu1 %v1022_v50, %s4103_s27 }
 0x2de   : > { %1124 = vrot.lane.b32.xlu0 %v1022_v50, %s4104_s28  ;;  %1130 = vrot.lane.b32.xlu1 %v1022_v50, %s4102_s19 }
 0x348   : > { %v1133_v63 = vpop.permute.xlu1 %1132  ;;  %v1121_v0 = vpop.permute.xlu0 %1120 }
 0x349   : > { %v1220_v3 = vcombine.low %v1121_v0, %v1133_v63  ;;  %v1221_v4 = vcombine.high %v1121_v0, %v1133_v63 }
 0x34b   : > { %v1228_v10 = vrot.slane %v1220_v3, %v4507_v2  ;;  %v1235_v11 = vrot.slane %v1221_v4, %v4507_v2 }
 0x34c   : > { %v1127_v5 = vpop.permute.xlu0 %1126  ;;  %v1119_v6 = vpop.permute.xlu1 %1118 }
 0x34d   : > { %v1204_v7 = vcombine.low %v1027_v47, %v1127_v5  ;;  %v1205_v8 = vcombine.high %v1027_v47, %v1127_v5 }
 0x34f   : > { %v1212_v12 = vrot.slane %v1204_v7, %v4507_v2  ;;  %v1219_v13 = vrot.slane %v1205_v8, %v4507_v2 }
 0x350   : > { %v1125_v14 = vpop.permute.xlu0 %1124  ;;  %v1131_v15 = vpop.permute.xlu1 %1130 }
 0x351   : > { %v1236_v16 = vcombine.low %v1212_v12, %v1228_v10  ;;  %v1237_v17 = vcombine.high %v1212_v12, %v1228_v10  ;;  %v1252_v18 = vcombine.low %v1219_v13, %v1235_v11  ;;  %v1253_v19 = vcombine.high %v1219_v13, %v1235_v11 }
 0x352   : > { %v1136_v20 = vcombine.low %v1022_v50, %v1125_v14  ;;  %v1137_v21 = vcombine.high %v1022_v50, %v1125_v14  ;;  %v1152_v22 = vcombine.low %v1119_v6, %v1131_v15  ;;  %v1153_v23 = vcombine.high %v1119_v6, %v1131_v15 }
 0x353   : > { %v1244_v24 = vrot.slane %v1236_v16, %v4509_v9  ;;  %v1251_v25 = vrot.slane %v1237_v17, %v4509_v9  ;;  %v1260_v27 = vrot.slane %v1252_v18, %v4509_v9  ;;  %v1267_v28 = vrot.slane %v1253_v19, %v4509_v9  ;;  %v1701_v16 = vld [vmem:[#allocation2 + $0x8] sm:$0xff]  ;;  %v1703_v17 = vld [vmem:[#allocation2 + $0x18] sm:$0xff] }
 0x354   : > { %v1144_v29 = vrot.slane %v1136_v20, %v4507_v2  ;;  %v1151_v30 = vrot.slane %v1137_v21, %v4507_v2  ;;  %v1160_v31 = vrot.slane %v1152_v22, %v4507_v2  ;;  %v1167_v32 = vrot.slane %v1153_v23, %v4507_v2  ;;  %v1704_v20 = vld [vmem:[#allocation2 + $0x20] sm:$0xff]  ;;  %v1706_v21 = vld [vmem:[#allocation2 + $0x30] sm:$0xff]  ;;  %v1705_v22 = vld [vmem:[#allocation2 + $0x28] sm:$0xff] }
 0x355   : > { %v1340_v33 = vcombine.low %v1244_v24, %v1251_v25  ;;  %v3336_v34 = vcombine.high %v1244_v24, %v1251_v25  ;;  %v1356_v26 = vcombine.low %v1260_v27, %v1267_v28  ;;  %v3337_v35 = vcombine.high %v1260_v27, %v1267_v28  ;;  %v1707_v23 = vld [vmem:[#allocation2 + $0x38] sm:$0xff]  ;;  %v3468_v24 = vpop.f32.mrf.mxu1 }
 0x356   : > { %v1168_v36 = vcombine.low %v1144_v29, %v1160_v31  ;;  %v1169_v37 = vcombine.high %v1144_v29, %v1160_v31  ;;  %v1184_v38 = vcombine.low %v1151_v30, %v1167_v32  ;;  %v1185_v39 = vcombine.high %v1151_v30, %v1167_v32 }
 0x357   : > { %v1347_v40 = vrot.slane %v1340_v33, %v4507_v2  ;;  %v1355_v41 = vrot.slane %v3336_v34, %v4507_v2  ;;  %v1363_v42 = vrot.slane %v1356_v26, %v4507_v2  ;;  %v1371_v43 = vrot.slane %v3337_v35, %v4507_v2  ;;  %v1107_v25 = vpop.f32.mrf.mxu1 }
 0x358   : > { %v1176_v44 = vrot.slane %v1168_v36, %v4509_v9  ;;  %v1183_v45 = vrot.slane %v1169_v37, %v4509_v9  ;;  %v1192_v46 = vrot.slane %v1184_v38, %v4509_v9  ;;  %v1199_v47 = vrot.slane %v1185_v39, %v4509_v9 }
 0x359   : > { %v1372_v48 = vcombine.low %v1347_v40, %v1355_v41  ;;  %v1388_v49 = vcombine.low %v1363_v42, %v1371_v43  ;;  %v1373_v56 = vcombine.high %v1347_v40, %v1355_v41  ;;  %v1389_v57 = vcombine.high %v1363_v42, %v1371_v43  ;;  %v3331_v43 = vld [vmem:[%s4957_s9] ss:$0 sm:$0xff] }
 0x35a   : > { %v1272_v50 = vcombine.low %v1176_v44, %v1183_v45  ;;  %v3334_v51 = vcombine.high %v1176_v44, %v1183_v45  ;;  %v1288_v52 = vcombine.low %v1192_v46, %v1199_v47  ;;  %v3335_v53 = vcombine.high %v1192_v46, %v1199_v47  ;;  %v2058_v46 = vld [vmem:[#allocation3 + $0x8] sm:$0xff] }
 0x35b   : > { %v1380_v54 = vrot.slane %v1372_v48, %v4509_v9  ;;  %v1396_v55 = vrot.slane %v1388_v49, %v4509_v9  ;;  %v1387_v3 = vrot.slane %v1373_v56, %v4509_v9  ;;  %v1403_v4 = vrot.slane %v1389_v57, %v4509_v9  ;;  %v2059_v48 = vld [vmem:[#allocation3 + $0x10] sm:$0xff]  ;;  %v2057_v57 = vld [vmem:[#allocation3] sm:$0xff] }
 0x35c   : > { %v1279_v58 = vrot.slane %v1272_v50, %v4507_v2  ;;  %v1287_v59 = vrot.slane %v3334_v51, %v4507_v2  ;;  %v1295_v60 = vrot.slane %v1288_v52, %v4507_v2  ;;  %v1303_v61 = vrot.slane %v3335_v53, %v4507_v2  ;;  %v2060_v51 = vld [vmem:[#allocation3 + $0x18] sm:$0xff] }
 0x35d   : > { %v1404_v62 = vcombine.low %v1380_v54, %v1396_v55  ;;  %v1405_v63 = vcombine.high %v1380_v54, %v1396_v55  ;;  %v1406_v12 = vcombine.low %v1387_v3, %v1403_v4  ;;  %v1407_v13 = vcombine.high %v1387_v3, %v1403_v4  ;;  %v4619_v3 = vld [vmem:[#allocation3 + $0x30] sm:$0xff]  ;;  %v2061_v4 = vld [vmem:[#allocation3 + $0x20] sm:$0xff] }
 0x35e   : > { %v1304_v0 = vcombine.low %v1279_v58, %v1287_v59  ;;  %v1320_v1 = vcombine.low %v1295_v60, %v1303_v61  ;;  %v1305_v5 = vcombine.high %v1279_v58, %v1287_v59  ;;  %v1321_v8 = vcombine.high %v1295_v60, %v1303_v61  ;;  %v2062_v58 = vld [vmem:[#allocation3 + $0x28] sm:$0xff] }
 0x35f   : > { %3469 = vmatprep.subr.msk.mxu0 %vm1708_vm4, %v1404_v62  ;;  %3476 = vmatprep.subr.msk.mxu1 %vm1708_vm4, %v1405_v63  ;;  %v4107_v41 = vmov 0   ;;  %v4600_v44 = vadd.f32 %v3468_v24, %v3331_v43  ;;  %v4608_v45 = vadd.f32 %v3331_v43, %v1107_v25 }
 0x360   : > { %3470 = vmatpush3.xpose.msk.msra.mxu0 %vm1708_vm4, %v1404_v62  ;;  %3477 = vmatpush3.xpose.msk.msra.mxu1 %vm1708_vm4, %v1405_v63  ;;  %v1312_v6 = vrot.slane %v1304_v0, %v4509_v9  ;;  %v1328_v7 = vrot.slane %v1320_v1, %v4509_v9  ;;  %v1319_v14 = vrot.slane %v1305_v5, %v4509_v9 }
 0x361   : > { %v1335_v15 = vrot.slane %v1321_v8, %v4509_v9  ;;  %3721 = vset.pattern.permute.xlu1 %v4107_v41  ;;  %3722 = vset.pattern.permute.xlu0 %v4107_v41 }
 0x362   : > { %v1336_v10 = vcombine.low %v1312_v6, %v1328_v7  ;;  %v1337_v11 = vcombine.high %v1312_v6, %v1328_v7 }
 0x363   : > { %v1338_v18 = vcombine.low %v1319_v14, %v1335_v15  ;;  %v1339_v19 = vcombine.high %v1319_v14, %v1335_v15 }
 0x364   : > { %3471 = vmatprep.subr.msk.mxu0 %vm1708_vm4, %v1336_v10  ;;  %3478 = vmatprep.subr.msk.mxu1 %vm1708_vm4, %v1337_v11 }
 0x365   : > { %3472 = vmatpush3.xpose.msk.msra.mxu0 %vm1708_vm4, %v1336_v10  ;;  %3479 = vmatpush3.xpose.msk.msra.mxu1 %vm1708_vm4, %v1337_v11 }
 0x366   : > { %3483 = vmatprep.subr.msk.mxu0 %vm1708_vm4, %v1406_v12  ;;  %3490 = vmatprep.subr.msk.mxu1 %vm1708_vm4, %v1407_v13 }
 0x368   : > { %3474 = vmatmul.mubr.msk.f32.vlgmr.msra.gmra.mxu0 %vm1708_vm4, %v1701_v16  ;;  %3481 = vmatmul.mubr.msk.f32.vlgmr.msra.gmra.mxu1 %vm1708_vm4, %v1703_v17 }
 0x369   : > { %3484 = vmatpush3.xpose.msk.msra.mxu0 %vm1708_vm4, %v1406_v12  ;;  %3491 = vmatpush3.xpose.msk.msra.mxu1 %vm1708_vm4, %v1407_v13  ;;  %v4626_v13 = vld [vmem:[#allocation3 + $0x38] sm:$0xff] }
 0x36a   : > { %3485 = vmatprep.subr.msk.mxu0 %vm1708_vm4, %v1338_v18  ;;  %3492 = vmatprep.subr.msk.mxu1 %vm1708_vm4, %v1339_v19 }
 0x36b   : > { %3487 = vmatprep.mubr.msk.f32.mxu0 %vm1708_vm4, %v1704_v20  ;;  %3494 = vmatprep.mubr.msk.f32.mxu1 %vm1708_vm4, %v1706_v21 }
 0x36d   : > { %3486 = vmatpush3.xpose.msk.msra.mxu0 %vm1708_vm4, %v1338_v18  ;;  %3493 = vmatpush3.xpose.msk.msra.mxu1 %vm1708_vm4, %v1339_v19 }
 0x370   : > { %3488 = vmatmul.mubr.msk.f32.vlgmr.msra.gmra.mxu0 %vm1708_vm4, %v1705_v22  ;;  %3495 = vmatmul.mubr.msk.f32.vlgmr.msra.gmra.mxu1 %vm1708_vm4, %v1707_v23 }
 0x428   : > { %v4565_v27 = vpop.f32.mrf.mxu0  ;;  %v4567_v28 = vpop.f32.mrf.mxu1 }
 0x429   : > { %v2069_v29 = vsel %vm2065_vm5, %v4565_v27, -inf  ;;  %v2075_v32 = vsel %vm2065_vm5, %v4567_v28, -inf }
 0x42a   : > { %v4571_v30 = vpop.f32.mrf.mxu1  ;;  %2070 = vmax.xlane.f32.xlu0 %v2069_v29  ;;  %v4577_v33 = vpop.f32.mrf.mxu0 }
 0x42b   : > { %v2072_v31 = vsel %vm2065_vm5, %v4571_v30, -inf  ;;  %v2066_v35 = vsel %vm2065_vm5, %v4577_v33, -inf }
 0x42c   : > { %2073 = vmax.xlane.f32.xlu1 %v2072_v31 }
 0x42e   : > { %2076 = vmax.xlane.f32.xlu0 %v2075_v32 }
 0x430   : > { %v4579_v34 = vpop.f32.mrf.mxu0  ;;  %v4581_v26 = vpop.f32.mrf.mxu1 }
 0x431   : > { %v2081_v36 = vsel %vm2065_vm5, %v4579_v34, -inf  ;;  %v2087_v42 = vsel %vm2065_vm5, %v4581_v26, -inf }
 0x432   : > { %v4587_v37 = vpop.f32.mrf.mxu1  ;;  %2067 = vmax.xlane.f32.xlu0 %v2066_v35  ;;  %2082 = vmax.xlane.f32.xlu1 %v2081_v36  ;;  %v4589_v38 = vpop.f32.mrf.mxu0 }
 0x433   : > { %v2084_v39 = vsel %vm2065_vm5, %v4587_v37, -inf  ;;  %v2078_v40 = vsel %vm2065_vm5, %v4589_v38, -inf }
 0x436   : > { %2085 = vmax.xlane.f32.xlu0 %v2084_v39  ;;  %2079 = vmax.xlane.f32.xlu1 %v2078_v40 }
 0x43a   : > { %2088 = vmax.xlane.f32.xlu0 %v2087_v42 }
 0x447   : > { %1412 = vrot.lane.b32.xlu1 %v4600_v44, %s4103_s27 }
 0x44b   : > { %1418 = vrot.lane.b32.xlu1 %v4600_v44, %s4104_s28 }
 0x44f   : > { %1424 = vrot.lane.b32.xlu1 %v4600_v44, %s4102_s19 }
 0x453   : > { %1410 = vrot.lane.b32.xlu1 %v4608_v45, %s4103_s27 }
 0x457   : > { %1416 = vrot.lane.b32.xlu1 %v4608_v45, %s4104_s28 }
 0x45b   : > { %1422 = vrot.lane.b32.xlu1 %v4608_v45, %s4102_s19 }
 0x4b3   : > { %v2071_v47 = vpop.xlane.xlu0 %2070 }
 0x4b4   : > { %v2091_v49 = vmax.f32 %v2058_v46, %v2071_v47 }
 0x4b5   : > { %v2074_v50 = vpop.xlane.xlu1 %2073 }
 0x4b6   : > { %v2099_v52 = vsub.f32 %v2058_v46, %v2091_v49  ;;  %2640 = vst.msk [vmem:[#allocation3 + $0x8] sm:$0xff] %vm2234_vm6, %v2091_v49  ;;  %v2092_v53 = vmax.f32 %v2059_v48, %v2074_v50  ;;  %2129 = vperm.xlu1 %3721, %v2091_v49  }
 0x4b7   : > { %v2077_v54 = vpop.xlane.xlu0 %2076 }
 0x4b8   : > { %v2108_v55 = vmul.f32 1.442695, %v2099_v52  ;;  %2641 = vst.msk [vmem:[#allocation3 + $0x10] sm:$0xff] %vm2234_vm6, %v2092_v53  ;;  %v2093_v56 = vmax.f32 %v2060_v51, %v2077_v54  ;;  %2134 = vperm.xlu0 %3722, %v2092_v53   ;;  %v2100_v1 = vsub.f32 %v2059_v48, %v2092_v53 }
 0x4ba   : > { %v2101_v59 = vsub.f32 %v2060_v51, %v2093_v56  ;;  %2642 = vst.msk [vmem:[#allocation3 + $0x18] sm:$0xff] %vm2234_vm6, %v2093_v56  ;;  %2139 = vperm.xlu1 %3721, %v2093_v56   ;;  %3723 = vpow2.f32 %v2108_v55  ;;  %v2110_v12 = vmul.f32 1.442695, %v2100_v1 }
 0x4bb   : > { %v2068_v60 = vpop.xlane.xlu0 %2067  ;;  %v2083_v61 = vpop.xlane.xlu1 %2082 }
 0x4bc   : > { %v2112_v62 = vmul.f32 1.442695, %v2101_v59  ;;  %v2090_v63 = vmax.f32 %v2057_v57, %v2068_v60  ;;  %v2095_v0 = vmax.f32 %v2062_v58, %v2083_v61 }
 0x4be   : > { %3725 = vpow2.f32 %v2112_v62  ;;  %v2098_v5 = vsub.f32 %v2057_v57, %v2090_v63  ;;  %2639 = vst.msk [vmem:[#allocation3] sm:$0xff] %vm2234_vm6, %v2090_v63  ;;  %2644 = vst.msk [vmem:[#allocation3 + $0x28] sm:$0xff] %vm2234_vm6, %v2095_v0  ;;  %2124 = vperm.xlu1 %3721, %v2090_v63   ;;  %v2103_v14 = vsub.f32 %v2062_v58, %v2095_v0 }
 0x4bf   : > { %v2086_v6 = vpop.xlane.xlu0 %2085  ;;  %v2080_v7 = vpop.xlane.xlu1 %2079 }
 0x4c0   : > { %v2106_v8 = vmul.f32 1.442695, %v2098_v5  ;;  %v4624_v10 = vmax.f32 %v4619_v3, %v2086_v6  ;;  %v2094_v11 = vmax.f32 %v2061_v4, %v2080_v7  ;;  %v2116_v21 = vmul.f32 1.442695, %v2103_v14 }
 0x4c2   : > { %3727 = vpow2.f32 %v2106_v8  ;;  %v2104_v15 = vsub.f32 %v4619_v3, %v4624_v10  ;;  %2645 = vst.msk [vmem:[#allocation3 + $0x30] sm:$0xff] %vm2234_vm6, %v4624_v10  ;;  %v2102_v16 = vsub.f32 %v2061_v4, %v2094_v11  ;;  %2643 = vst.msk [vmem:[#allocation3 + $0x20] sm:$0xff] %vm2234_vm6, %v2094_v11  ;;  %2154 = vperm.xlu1 %3721, %v4624_v10   ;;  %2144 = vperm.xlu0 %3722, %v2094_v11  }
 0x4c3   : > { %v2089_v17 = vpop.xlane.xlu0 %2088  ;;  %v1413_v18 = vpop.permute.xlu1 %1412  ;;  %3729 = vpow2.f32 %v2110_v12 }
 0x4c4   : > { %v2114_v19 = vmul.f32 1.442695, %v2102_v16  ;;  %v4635_v20 = vmax.f32 %v4626_v13, %v2089_v17 }
 0x4c6   : > { %v2105_v22 = vsub.f32 %v4626_v13, %v4635_v20  ;;  %2646 = vst.msk [vmem:[#allocation3 + $0x38] sm:$0xff] %vm2234_vm6, %v4635_v20  ;;  %2159 = vperm.xlu1 %3721, %v4635_v20   ;;  %2149 = vperm.xlu0 %3722, %v2095_v0   ;;  %3731 = vpow2.f32 %v2114_v19 }
 0x4c7   : > { %v1419_v23 = vpop.permute.xlu1 %1418  ;;  %v4642_v24 = vpop.eup %3723  ;;  %3733 = vpow2.f32 %v2116_v21 }
 0x4c8   : > { %v1496_v25 = vcombine.low %v4600_v44, %v1419_v23  ;;  %v1497_v29 = vcombine.high %v4600_v44, %v1419_v23 }
 0x4ca   : > { %2258 = vperm.xlu0 %3722, %v4642_v24   ;;  %v1504_v39 = vrot.slane %v1496_v25, %v4507_v2  ;;  %v1511_v40 = vrot.slane %v1497_v29, %v4507_v2 }
 0x4cb   : > { %v4647_v31 = vpop.eup %3725  ;;  %v1425_v32 = vpop.permute.xlu1 %1424 }
 0x4cc   : > { %v1512_v35 = vcombine.low %v1413_v18, %v1425_v32  ;;  %v1513_v36 = vcombine.high %v1413_v18, %v1425_v32  ;;  %2268 = vperm.xlu1 %3721, %v4647_v31  }
 0x4ce   : > { %v1520_v41 = vrot.slane %v1512_v35, %v4507_v2  ;;  %v1527_v42 = vrot.slane %v1513_v36, %v4507_v2 }
 0x4cf   : > { %v4654_v43 = vpop.eup %3727  ;;  %v1411_v44 = vpop.permute.xlu1 %1410 }
 0x4d0   : > { %v1528_v46 = vcombine.low %v1504_v39, %v1520_v41  ;;  %v1529_v47 = vcombine.high %v1504_v39, %v1520_v41  ;;  %v1544_v48 = vcombine.low %v1511_v40, %v1527_v42  ;;  %v1545_v49 = vcombine.high %v1511_v40, %v1527_v42  ;;  %2253 = vperm.xlu1 %3721, %v4654_v43   ;;  %v4661_v54 = vpop.eup %3729 }
 0x4d2   : > { %v1536_v50 = vrot.slane %v1528_v46, %v4509_v9  ;;  %v1543_v51 = vrot.slane %v1529_v47, %v4509_v9  ;;  %v1552_v52 = vrot.slane %v1544_v48, %v4509_v9  ;;  %v1559_v53 = vrot.slane %v1545_v49, %v4509_v9 }
 0x4d3   : > { %v1417_v55 = vpop.permute.xlu1 %1416  ;;  %v4663_v56 = vpop.eup %3731 }
 0x4d4   : > { %v1632_v57 = vcombine.low %v1536_v50, %v1543_v51  ;;  %v3340_v58 = vcombine.high %v1536_v50, %v1543_v51  ;;  %v1648_v59 = vcombine.low %v1552_v52, %v1559_v53  ;;  %v3341_v60 = vcombine.high %v1552_v52, %v1559_v53  ;;  %2263 = vperm.xlu1 %3721, %v4661_v54   ;;  %v4673_v5 = vpop.eup %3733 }
 0x4d5   : > { %v1428_v61 = vcombine.low %v4608_v45, %v1417_v55  ;;  %v1429_v62 = vcombine.high %v4608_v45, %v1417_v55  ;;  %2273 = vperm.xlu0 %3722, %v4663_v56  }
 0x4d6   : > { %v1639_v63 = vrot.slane %v1632_v57, %v4507_v2  ;;  %v1647_v0 = vrot.slane %v3340_v58, %v4507_v2  ;;  %v1655_v1 = vrot.slane %v1648_v59, %v4507_v2  ;;  %v1663_v4 = vrot.slane %v3341_v60, %v4507_v2 }
 0x4d7   : > { %v1423_v6 = vpop.permute.xlu1 %1422  ;;  %v1436_v45 = vrot.slane %v1428_v61, %v4507_v2  ;;  %v1443_v14 = vrot.slane %v1429_v62, %v4507_v2 }
 0x4d8   : > { %v1444_v7 = vcombine.low %v1411_v44, %v1423_v6  ;;  %v1445_v8 = vcombine.high %v1411_v44, %v1423_v6  ;;  %2278 = vperm.xlu1 %3721, %v4673_v5   ;;  %v1664_v11 = vcombine.low %v1639_v63, %v1647_v0  ;;  %v1680_v12 = vcombine.low %v1655_v1, %v1663_v4 }
 0x4d9   : > { %v1665_v48 = vcombine.high %v1639_v63, %v1647_v0  ;;  %v1681_v49 = vcombine.high %v1655_v1, %v1663_v4 }
 0x4da   : > { %v1452_v16 = vrot.slane %v1444_v7, %v4507_v2  ;;  %v1459_v17 = vrot.slane %v1445_v8, %v4507_v2  ;;  %v1672_v18 = vrot.slane %v1664_v11, %v4509_v9  ;;  %v1688_v19 = vrot.slane %v1680_v12, %v4509_v9 }
 0x4db   : > { %v1679_v60 = vrot.slane %v1665_v48, %v4509_v9  ;;  %v1695_v61 = vrot.slane %v1681_v49, %v4509_v9 }
 0x4dc   : > { %v1460_v21 = vcombine.low %v1436_v45, %v1452_v16  ;;  %v1461_v23 = vcombine.high %v1436_v45, %v1452_v16  ;;  %v1476_v25 = vcombine.low %v1443_v14, %v1459_v17  ;;  %v1477_v29 = vcombine.high %v1443_v14, %v1459_v17 }
 0x4dd   : > { %v1696_v32 = vcombine.low %v1672_v18, %v1688_v19  ;;  %v1697_v35 = vcombine.high %v1672_v18, %v1688_v19  ;;  %v1698_v11 = vcombine.low %v1679_v60, %v1695_v61  ;;  %v1699_v12 = vcombine.high %v1679_v60, %v1695_v61 }
 0x4de   : > { %v1468_v36 = vrot.slane %v1460_v21, %v4509_v9  ;;  %v1475_v39 = vrot.slane %v1461_v23, %v4509_v9  ;;  %v1484_v40 = vrot.slane %v1476_v25, %v4509_v9  ;;  %v1491_v41 = vrot.slane %v1477_v29, %v4509_v9 }
 0x4df   : > { %3497 = vmatprep.subr.mxu0 %v1696_v32  ;;  %3504 = vmatprep.subr.mxu1 %v1697_v35 }
 0x4e0   : > { %v1564_v42 = vcombine.low %v1468_v36, %v1475_v39  ;;  %v3338_v44 = vcombine.high %v1468_v36, %v1475_v39  ;;  %v1580_v46 = vcombine.low %v1484_v40, %v1491_v41  ;;  %v3339_v47 = vcombine.high %v1484_v40, %v1491_v41  ;;  %3498 = vmatpush3.msra.mxu0 %v1696_v32 }
 0x4e1   : > { %3505 = vmatpush3.msra.mxu1 %v1697_v35 }
 0x4e2   : > { %v1571_v50 = vrot.slane %v1564_v42, %v4507_v2  ;;  %v1579_v51 = vrot.slane %v3338_v44, %v4507_v2  ;;  %v1587_v52 = vrot.slane %v1580_v46, %v4507_v2  ;;  %v1595_v53 = vrot.slane %v3339_v47, %v4507_v2 }
 0x4e4   : > { %v1596_v55 = vcombine.low %v1571_v50, %v1579_v51  ;;  %v1612_v57 = vcombine.low %v1587_v52, %v1595_v53  ;;  %v1597_v58 = vcombine.high %v1571_v50, %v1579_v51  ;;  %v1613_v59 = vcombine.high %v1587_v52, %v1595_v53 }
 0x4e6   : > { %v1604_v62 = vrot.slane %v1596_v55, %v4509_v9  ;;  %v1620_v63 = vrot.slane %v1612_v57, %v4509_v9  ;;  %v1611_v0 = vrot.slane %v1597_v58, %v4509_v9  ;;  %v1627_v1 = vrot.slane %v1613_v59, %v4509_v9 }
 0x4e7   : > { %v2120_v59 = vmul.f32 1.442695, %v2105_v22 }
 0x4e8   : > { %v1628_v4 = vcombine.low %v1604_v62, %v1620_v63  ;;  %v1629_v6 = vcombine.high %v1604_v62, %v1620_v63  ;;  %v1631_v7 = vcombine.high %v1611_v0, %v1627_v1  ;;  %v1630_v8 = vcombine.low %v1611_v0, %v1627_v1 }
 0x4e9   : > { %v2118_v63 = vmul.f32 1.442695, %v2104_v15 }
 0x4ea   : > { %3499 = vmatprep.subr.mxu0 %v1628_v4  ;;  %3506 = vmatprep.subr.mxu1 %v1629_v6 }
 0x4eb   : > { %3500 = vmatpush3.msra.mxu0 %v1628_v4  ;;  %3507 = vmatpush3.msra.mxu1 %v1629_v6 }
 0x4ec   : > { %3511 = vmatprep.subr.mxu0 %v1698_v11  ;;  %3518 = vmatprep.subr.mxu1 %v1699_v12 }
 0x531   : > { %v2130_v45 = vpop.permute.xlu1 %2129 }
 0x532   : > { %v2163_v14 = vsub.f32 %v4565_v27, %v2130_v45  ;;  %v2189_v45 = vld [vmem:[#allocation4 + $0x18] sm:$0xff] }
 0x533   : > { %v2135_v16 = vpop.permute.xlu0 %2134  ;;  %v2197_v10 = vmul.f32 %v4647_v31, %v2189_v45 }
 0x534   : > { %v2172_v17 = vmul.f32 1.442695, %v2163_v14  ;;  %v2164_v18 = vsub.f32 %v4571_v30, %v2135_v16  ;;  %v2186_v14 = vld [vmem:[#allocation4] sm:$0xff] }
 0x535   : > { %v2140_v19 = vpop.permute.xlu1 %2139 }
 0x536   : > { %3735 = vpow2.f32 %v2172_v17  ;;  %v2174_v21 = vmul.f32 1.442695, %v2164_v18  ;;  %v2165_v23 = vsub.f32 %v4567_v28, %v2140_v19  ;;  %v2194_v17 = vmul.f32 %v4654_v43, %v2186_v14  ;;  %v2190_v19 = vld [vmem:[#allocation4 + $0x20] sm:$0xff] }
 0x538   : > { %3737 = vpow2.f32 %v2174_v21  ;;  %v2176_v25 = vmul.f32 1.442695, %v2165_v23  ;;  %v2198_v23 = vmul.f32 %v4663_v56, %v2190_v19 }
 0x539   : > { %v2125_v29 = vpop.permute.xlu1 %2124 }
 0x53a   : > { %3739 = vpow2.f32 %v2176_v25  ;;  %v2162_v32 = vsub.f32 %v4577_v33, %v2125_v29 }
 0x53c   : > { %v2170_v35 = vmul.f32 1.442695, %v2162_v32  ;;  %v2192_v32 = vld [vmem:[#allocation4 + $0x30] sm:$0xff] }
 0x53d   : > { %v2145_v36 = vpop.permute.xlu0 %2144  ;;  %v2155_v39 = vpop.permute.xlu1 %2154 }
 0x53e   : > { %3741 = vpow2.f32 %v2170_v35  ;;  %v2166_v27 = vsub.f32 %v4589_v38, %v2145_v36  ;;  %v2168_v40 = vsub.f32 %v4587_v37, %v2155_v39  ;;  %v2191_v36 = vld [vmem:[#allocation4 + $0x28] sm:$0xff] }
 0x53f   : > { %v2199_v43 = vmul.f32 %v4673_v5, %v2191_v36 }
 0x540   : > { %v2178_v30 = vmul.f32 1.442695, %v2166_v27  ;;  %v2182_v41 = vmul.f32 1.442695, %v2168_v40 }
 0x541   : > { %v2150_v42 = vpop.permute.xlu0 %2149  ;;  %v2160_v44 = vpop.permute.xlu1 %2159 }
 0x542   : > { %3743 = vpow2.f32 %v2178_v30  ;;  %v2167_v28 = vsub.f32 %v4579_v34, %v2150_v42  ;;  %v2169_v46 = vsub.f32 %v4581_v26, %v2160_v44  ;;  %v2193_v42 = vld [vmem:[#allocation4 + $0x38] sm:$0xff] }
 0x543   : > { %v3736_v47 = vpop.eup %3735  ;;  %3745 = vpow2.f32 %v2182_v41 }
 0x544   : > { %v2180_v33 = vmul.f32 1.442695, %v2167_v28  ;;  %v2184_v48 = vmul.f32 1.442695, %v2169_v46  ;;  %v2205_v49 = vsel %vm2065_vm5, %v3736_v47, 0.0  ;;  %v2246_v46 = vld [vmem:[#allocation5 + $0x18] sm:$0xff] }
 0x545   : > { %v3738_v50 = vpop.eup %3737  ;;  %2206 = vadd.xlane.f32.xlu1 %v2205_v49  ;;  %v2259_v4 = vpop.permute.xlu0 %2258  ;;  %v2244_v49 = vld [vmem:[#allocation5 + $0x8] sm:$0xff] }
 0x546   : > { %3747 = vpow2.f32 %v2180_v33  ;;  %3508 = vmatprep.mubr.msk.f32.mxu1 %vm2065_vm5, %v3738_v50  ;;  %v2208_v55 = vsel %vm2065_vm5, %v3738_v50, 0.0 }
 0x547   : > { %v3740_v37 = vpop.eup %3739  ;;  %3749 = vpow2.f32 %v2184_v48  ;;  %v2269_v22 = vpop.permute.xlu1 %2268 }
 0x548   : > { %3509 = vmatmul.mubr.msk.f32.vlgmr.msra.gmra.mxu1 %vm2065_vm5, %v3740_v37  ;;  %v2211_v38 = vsel %vm2065_vm5, %v3740_v37, 0.0  ;;  %3751 = vpow2.f32 %v2120_v59  ;;  %v2294_v33 = vmul.f32 %v2269_v22, %v2246_v46  ;;  %v2250_v59 = vld [vmem:[#allocation5 + $0x38] sm:$0xff] }
 0x549   : > { %3519 = vmatpush3.msra.mxu1 %v1699_v12  ;;  %2212 = vadd.xlane.f32.xlu0 %v2211_v38  ;;  %3753 = vpow2.f32 %v2118_v63  ;;  %v2243_v38 = vld [vmem:[#allocation5] sm:$0xff]  ;;  %v2249_v63 = vld [vmem:[#allocation5 + $0x30] sm:$0xff] }
 0x54a   : > { %3520 = vmatprep.subr.mxu1 %v1631_v7 }
 0x54b   : > { %v3742_v34 = vpop.eup %3741  ;;  %3521 = vmatpush3.msra.mxu1 %v1631_v7  ;;  %v2254_v0 = vpop.permute.xlu1 %2253  ;;  %v2187_v7 = vld [vmem:[#allocation4 + $0x8] sm:$0xff] }
 0x54c   : > { %3501 = vmatprep.mubr.msk.f32.mxu0 %vm2065_vm5, %v3742_v34  ;;  %v2202_v26 = vsel %vm2065_vm5, %v3742_v34, 0.0 }
 0x54d   : > { %3502 = vmatmul.mubr.msk.f32.vlgmr.msra.gmra.mxu0 %vm2065_vm5, %v3736_v47  ;;  %2203 = vadd.xlane.f32.xlu0 %v2202_v26  ;;  %v2245_v47 = vld [vmem:[#allocation5 + $0x10] sm:$0xff]  ;;  %v2292_v26 = vmul.f32 %v2259_v4, %v2244_v49 }
 0x54e   : > { %3512 = vmatpush3.msra.mxu0 %v1698_v11 }
 0x54f   : > { %v3744_v51 = vpop.eup %3743  ;;  %3513 = vmatprep.subr.mxu0 %v1630_v8  ;;  %v2264_v1 = vpop.permute.xlu1 %2263 }
 0x550   : > { %v3746_v52 = vpop.eup %3745  ;;  %3514 = vmatpush3.msra.mxu0 %v1630_v8  ;;  %3515 = vmatprep.mubr.msk.f32.mxu0 %vm2065_vm5, %v3744_v51  ;;  %v2214_v53 = vsel %vm2065_vm5, %v3744_v51, 0.0  ;;  %v2195_v8 = vmul.f32 %v4642_v24, %v2187_v7  ;;  %v4729_v11 = vpop.permute.xlu0 %2273  ;;  %v2188_v24 = vld [vmem:[#allocation4 + $0x10] sm:$0xff]  ;;  %v2293_v5 = vmul.f32 %v2264_v1, %v2245_v47 }
 0x551   : > { %3522 = vmatprep.mubr.msk.f32.mxu1 %vm2065_vm5, %v3746_v52  ;;  %2215 = vadd.xlane.f32.xlu1 %v2214_v53  ;;  %v2220_v61 = vsel %vm2065_vm5, %v3746_v52, 0.0  ;;  %v2196_v25 = vmul.f32 %v4661_v54, %v2188_v24  ;;  %v2291_v52 = vmul.f32 %v2254_v0, %v2243_v38 }
 0x552   : > { %2209 = vadd.xlane.f32.xlu0 %v2208_v55 }
 0x553   : > { %v3748_v57 = vpop.eup %3747  ;;  %v4726_v6 = vpop.permute.xlu1 %2278 }
 0x554   : > { %v3750_v58 = vpop.eup %3749  ;;  %3516 = vmatmul.mubr.msk.f32.vlgmr.msra.gmra.mxu0 %vm2065_vm5, %v3748_v57  ;;  %v2217_v60 = vsel %vm2065_vm5, %v3748_v57, 0.0  ;;  %v2248_v57 = vld [vmem:[#allocation5 + $0x28] sm:$0xff] }
 0x555   : > { %3523 = vmatmul.mubr.msk.f32.vlgmr.msra.gmra.mxu1 %vm2065_vm5, %v3750_v58  ;;  %2221 = vadd.xlane.f32.xlu1 %v2220_v61  ;;  %v2223_v62 = vsel %vm2065_vm5, %v3750_v58, 0.0  ;;  %v3752_v13 = vpop.eup %3751  ;;  %v2247_v61 = vld [vmem:[#allocation5 + $0x20] sm:$0xff] }
 0x556   : > { %2218 = vadd.xlane.f32.xlu0 %v2217_v60  ;;  %v3754_v20 = vpop.eup %3753  ;;  %v2201_v54 = vmul.f32 %v3752_v13, %v2193_v42  ;;  %v2295_v1 = vmul.f32 %v4729_v11, %v2247_v61 }
 0x557   : > { %v2200_v27 = vmul.f32 %v3754_v20, %v2192_v32 }
 0x55a   : > { %2224 = vadd.xlane.f32.xlu0 %v2223_v62  ;;  %v2296_v62 = vmul.f32 %v4726_v6, %v2248_v57 }
 0x566   : > { %2288 = vperm.xlu1 %3721, %v3752_v13  }
 0x570   : > { %2283 = vperm.xlu0 %3722, %v3754_v20  }
 0x5ce   : > { %v2207_v12 = vpop.xlane.xlu1 %2206 }
 0x5cf   : > { %v2227_v3 = vadd.f32 %v2207_v12, %v2195_v8 }
 0x5d1   : > { %2236 = vst.msk [vmem:[#allocation4 + $0x8] sm:$0xff] %vm2234_vm6, %v2227_v3 }
 0x5d2   : > { %v2213_v15 = vpop.xlane.xlu0 %2212 }
 0x5d3   : > { %v2229_v16 = vadd.f32 %v2213_v15, %v2197_v10 }
 0x5d5   : > { %2238 = vst.msk [vmem:[#allocation4 + $0x18] sm:$0xff] %vm2234_vm6, %v2229_v16 }
 0x5d6   : > { %v2204_v18 = vpop.xlane.xlu0 %2203 }
 0x5d7   : > { %v2226_v21 = vadd.f32 %v2204_v18, %v2194_v17 }
 0x5d9   : > { %2235 = vst.msk [vmem:[#allocation4] sm:$0xff] %vm2234_vm6, %v2226_v21 }
 0x5da   : > { %v2216_v29 = vpop.xlane.xlu1 %2215 }
 0x5db   : > { %v2210_v31 = vpop.xlane.xlu0 %2209  ;;  %v2230_v35 = vadd.f32 %v2216_v29, %v2198_v23 }
 0x5dc   : > { %v2228_v39 = vadd.f32 %v2210_v31, %v2196_v25 }
 0x5dd   : > { %2239 = vst.msk [vmem:[#allocation4 + $0x20] sm:$0xff] %vm2234_vm6, %v2230_v35 }
 0x5de   : > { %2237 = vst.msk [vmem:[#allocation4 + $0x10] sm:$0xff] %vm2234_vm6, %v2228_v39  ;;  %v2222_v40 = vpop.xlane.xlu1 %2221 }
 0x5df   : > { %v2219_v30 = vpop.xlane.xlu0 %2218  ;;  %v2232_v41 = vadd.f32 %v2222_v40, %v2200_v27 }
 0x5e0   : > { %v2231_v56 = vadd.f32 %v2219_v30, %v2199_v43 }
 0x5e1   : > { %2241 = vst.msk [vmem:[#allocation4 + $0x30] sm:$0xff] %vm2234_vm6, %v2232_v41 }
 0x5e2   : > { %2240 = vst.msk [vmem:[#allocation4 + $0x28] sm:$0xff] %vm2234_vm6, %v2231_v56  ;;  %v2289_v60 = vpop.permute.xlu1 %2288 }
 0x5e3   : > { %v2225_v44 = vpop.xlane.xlu0 %2224  ;;  %v2298_v20 = vmul.f32 %v2289_v60, %v2250_v59 }
 0x5e4   : > { %v2233_v28 = vadd.f32 %v2225_v44, %v2201_v54 }
 0x5e6   : > { %2242 = vst.msk [vmem:[#allocation4 + $0x38] sm:$0xff] %vm2234_vm6, %v2233_v28 }
 0x5eb   : > { %v2284_v13 = vpop.permute.xlu0 %2283 }
 0x5ec   : > { %v2297_v7 = vmul.f32 %v2284_v13, %v2249_v63 }
 0x608   : > { %v3510_v48 = vpop.f32.mrf.mxu1 }
 0x609   : > { %v2626_v50 = vadd.f32 %v3510_v48, %v2294_v33 }
 0x60a   : > { %v2452_v37 = vpop.f32.mrf.mxu1 }
 0x60b   : > { %2634 = vst.msk [vmem:[#allocation5 + $0x18] sm:$0xff] %vm1708_vm4, %v2626_v50  ;;  %v2625_v34 = vadd.f32 %v2452_v37, %v2293_v5 }
 0x60d   : > { %2633 = vst.msk [vmem:[#allocation5 + $0x10] sm:$0xff] %vm1708_vm4, %v2625_v34  ;;  %v3503_v51 = vpop.f32.mrf.mxu0 }
 0x60e   : > { %v2624_v53 = vadd.f32 %v3503_v51, %v2292_v26 }
 0x60f   : > { %v2371_v55 = vpop.f32.mrf.mxu0 }
 0x610   : > { %2632 = vst.msk [vmem:[#allocation5 + $0x8] sm:$0xff] %vm1708_vm4, %v2624_v53  ;;  %v2623_v58 = vadd.f32 %v2371_v55, %v2291_v52 }
 0x612   : > { %2631 = vst.msk [vmem:[#allocation5] sm:$0xff] %vm1708_vm4, %v2623_v58 }
 0x614   : > { %v3517_v22 = vpop.f32.mrf.mxu0 }
 0x615   : > { %v2628_v0 = vadd.f32 %v3517_v22, %v2296_v62  ;;  %v3524_v4 = vpop.f32.mrf.mxu1 }
 0x616   : > { %v2630_v8 = vadd.f32 %v3524_v4, %v2298_v20  ;;  %v2533_v12 = vpop.f32.mrf.mxu0  ;;  %2650 = sbr.rel (%p3366_p9) target bundleno = 2058 (0x80a), region = 92 }
 0x617   : > { %2636 = vst.msk [vmem:[#allocation5 + $0x28] sm:$0xff] %vm1708_vm4, %v2628_v0  ;;  %v2627_v45 = vadd.f32 %v2533_v12, %v2295_v1  ;;  %v2614_v3 = vpop.f32.mrf.mxu1 }
 0x618   : > { %2638 = vst.msk [vmem:[#allocation5 + $0x38] sm:$0xff] %vm1708_vm4, %v2630_v8  ;;  %v2629_v10 = vadd.f32 %v2614_v3, %v2297_v7 }
 0x619   : > { %2635 = vst.msk [vmem:[#allocation5 + $0x20] sm:$0xff] %vm1708_vm4, %v2627_v45 }
 0x61a   : > { %2637 = vst.msk [vmem:[#allocation5 + $0x30] sm:$0xff] %vm1708_vm4, %v2629_v10 }
 0x61b   : > { %v2655_v6 = vld [vmem:[#allocation4 + $0x20] sm:$0xff]  ;;  %v2657_v15 = vld [vmem:[#allocation4 + $0x30] sm:$0xff]  ;;  %v4108_v14 = vmov 0   ;;  %v2654_v17 = vld [vmem:[#allocation4 + $0x18] sm:$0xff]  ;;  %vm3023_vm7 = vcmask 195584  }
 0x61c   : > { %v2651_v11 = vld [vmem:[#allocation4] sm:$0xff]  ;;  %3756 = vset.pattern.permute.xlu1 %v4108_v14  ;;  %3755 = vset.pattern.permute.xlu0 %v4108_v14  ;;  %3757 = vrcp.f32 %v2655_v6  ;;  %v2653_v16 = vld [vmem:[#allocation4 + $0x10] sm:$0xff]  ;;  %v2652_v18 = vld [vmem:[#allocation4 + $0x8] sm:$0xff] }
 0x61d   : > { %3759 = vrcp.f32 %v2651_v11  ;;  %v2658_v19 = vld [vmem:[#allocation4 + $0x38] sm:$0xff]  ;;  %v2656_v21 = vld [vmem:[#allocation4 + $0x28] sm:$0xff]  ;;  %v2667_v27 = vld [vmem:[#allocation5] sm:$0xff] }
 0x61e   : > { %3761 = vrcp.f32 %v2657_v15  ;;  %v2669_v56 = vld [vmem:[#allocation5 + $0x10] sm:$0xff]  ;;  %v2670_v51 = vld [vmem:[#allocation5 + $0x18] sm:$0xff]  ;;  %v2668_v59 = vld [vmem:[#allocation5 + $0x8] sm:$0xff] }
 0x61f   : > { %3763 = vrcp.f32 %v2653_v16  ;;  %v2674_v52 = vld [vmem:[#allocation5 + $0x38] sm:$0xff]  ;;  %v2672_v61 = vld [vmem:[#allocation5 + $0x28] sm:$0xff] }
 0x620   : > { %3765 = vrcp.f32 %v2654_v17  ;;  %v2671_v39 = vld [vmem:[#allocation5 + $0x20] sm:$0xff] }
 0x621   : > { %3767 = vrcp.f32 %v2652_v18  ;;  %v2673_v42 = vld [vmem:[#allocation5 + $0x30] sm:$0xff] }
 0x622   : > { %3769 = vrcp.f32 %v2658_v19 }
 0x623   : > { %3771 = vrcp.f32 %v2656_v21 }
 0x629   : > { %v3758_v24 = vpop.eup %3757 }
 0x62a   : > { %v3760_v23 = vpop.eup %3759  ;;  %2697 = vperm.xlu1 %3756, %v3758_v24  }
 0x62b   : > { %v3762_v25 = vpop.eup %3761  ;;  %2677 = vperm.xlu0 %3755, %v3760_v23  }
 0x62c   : > { %v3764_v29 = vpop.eup %3763 }
 0x62d   : > { %v3766_v32 = vpop.eup %3765 }
 0x62e   : > { %2707 = vperm.xlu1 %3756, %v3762_v25   ;;  %v3768_v31 = vpop.eup %3767 }
 0x62f   : > { %2687 = vperm.xlu0 %3755, %v3764_v29   ;;  %v3770_v35 = vpop.eup %3769 }
 0x630   : > { %v3772_v36 = vpop.eup %3771 }
 0x632   : > { %2692 = vperm.xlu1 %3756, %v3766_v32  }
 0x633   : > { %2682 = vperm.xlu0 %3755, %v3768_v31  }
 0x636   : > { %2712 = vperm.xlu1 %3756, %v3770_v35  }
 0x637   : > { %2702 = vperm.xlu0 %3755, %v3772_v36  }
 0x6a5   : > { %v2698_v43 = vpop.permute.xlu1 %2697 }
 0x6a6   : > { %v2678_v40 = vpop.permute.xlu0 %2677  ;;  %v2719_v30 = vmul.f32 %v2698_v43, %v2671_v39 }
 0x6a7   : > { %v2715_v41 = vmul.f32 %v2678_v40, %v2667_v27 }
 0x6a9   : > { %v2708_v54 = vpop.permute.xlu1 %2707  ;;  %v2723_v46 = vcombine.low %v2715_v41, %v2719_v30  ;;  %v2724_v47 = vcombine.high %v2715_v41, %v2719_v30  ;;  %v3029_v30 = vld [vmem:[#allocation15 + $0x18] sm:$0xff]  ;;  %v3028_v41 = vld [vmem:[#allocation15 + $0x10] sm:$0xff] }
 0x6aa   : > { %v2721_v44 = vmul.f32 %v2708_v54, %v2673_v42  ;;  %v2688_v28 = vpop.permute.xlu0 %2687  ;;  %3525 = vmatprep.subr.mxu0 %v3029_v30 }
 0x6ab   : > { %v2717_v33 = vmul.f32 %v2688_v28, %v2669_v56  ;;  %v2731_v37 = vrot.slane %v2723_v46, %v4507_v2  ;;  %v2738_v38 = vrot.slane %v2724_v47, %v4507_v2  ;;  %3526 = vmatpush3.msra.mxu0 %v3029_v30 }
 0x6ac   : > { %3527 = vmatprep.subr.mxu0 %v3028_v41 }
 0x6ad   : > { %v2739_v48 = vcombine.low %v2717_v33, %v2721_v44  ;;  %v2740_v49 = vcombine.high %v2717_v33, %v2721_v44  ;;  %v2693_v5 = vpop.permute.xlu1 %2692  ;;  %3528 = vmatpush3.msra.mxu0 %v3028_v41 }
 0x6ae   : > { %v2683_v50 = vpop.permute.xlu0 %2682  ;;  %v2718_v62 = vmul.f32 %v2693_v5, %v2670_v51 }
 0x6af   : > { %v2747_v34 = vrot.slane %v2739_v48, %v4507_v2  ;;  %v2754_v26 = vrot.slane %v2740_v49, %v4507_v2  ;;  %v2716_v4 = vmul.f32 %v2683_v50, %v2668_v59 }
 0x6b1   : > { %v2755_v53 = vcombine.low %v2731_v37, %v2747_v34  ;;  %v2756_v55 = vcombine.high %v2731_v37, %v2747_v34  ;;  %v2771_v57 = vcombine.low %v2738_v38, %v2754_v26  ;;  %v2772_v58 = vcombine.high %v2738_v38, %v2754_v26  ;;  %v2713_v60 = vpop.permute.xlu1 %2712  ;;  %v3027_v37 = vld [vmem:[#allocation15 + $0x8] sm:$0xff]  ;;  %v3026_v38 = vld [vmem:[#allocation15] sm:$0xff] }
 0x6b2   : > { %v2722_v63 = vmul.f32 %v2713_v60, %v2674_v52  ;;  %v2703_v13 = vpop.permute.xlu0 %2702  ;;  %3529 = vmatprep.subr.mxu0 %v3027_v37 }
 0x6b3   : > { %v2763_v20 = vrot.slane %v2755_v53, %v4509_v9  ;;  %v2770_v22 = vrot.slane %v2756_v55, %v4509_v9  ;;  %v2779_v1 = vrot.slane %v2771_v57, %v4509_v9  ;;  %v2786_v0 = vrot.slane %v2772_v58, %v4509_v9  ;;  %3530 = vmatpush3.msra.mxu0 %v3027_v37 }
 0x6b4   : > { %v2807_v7 = vcombine.low %v2718_v62, %v2722_v63  ;;  %v2808_v8 = vcombine.high %v2718_v62, %v2722_v63  ;;  %v2720_v12 = vmul.f32 %v2703_v13, %v2672_v61  ;;  %3531 = vmatprep.subr.mxu0 %v3026_v38 }
 0x6b5   : > { %v2859_v45 = vcombine.low %v2763_v20, %v2770_v22  ;;  %v3367_v3 = vcombine.high %v2763_v20, %v2770_v22  ;;  %v2875_v10 = vcombine.low %v2779_v1, %v2786_v0  ;;  %v3368_v6 = vcombine.high %v2779_v1, %v2786_v0  ;;  %3532 = vmatpush3.msra.mxu0 %v3026_v38 }
 0x6b6   : > { %v2815_v11 = vrot.slane %v2807_v7, %v4507_v2  ;;  %v2822_v15 = vrot.slane %v2808_v8, %v4507_v2  ;;  %v2791_v14 = vcombine.low %v2716_v4, %v2720_v12  ;;  %v2792_v16 = vcombine.high %v2716_v4, %v2720_v12 }
 0x6b7   : > { %v2866_v17 = vrot.slane %v2859_v45, %v4507_v2  ;;  %v2874_v18 = vrot.slane %v3367_v3, %v4507_v2  ;;  %v2882_v19 = vrot.slane %v2875_v10, %v4507_v2  ;;  %v2890_v21 = vrot.slane %v3368_v6, %v4507_v2 }
 0x6b8   : > { %v2799_v24 = vrot.slane %v2791_v14, %v4507_v2  ;;  %v2806_v23 = vrot.slane %v2792_v16, %v4507_v2  ;;  %v3371_v14 = vld [vmem:[%s4959_s8] ss:$0 sm:$0xff] }
 0x6b9   : > { %v2891_v25 = vcombine.low %v2866_v17, %v2874_v18  ;;  %v2907_v29 = vcombine.low %v2882_v19, %v2890_v21  ;;  %v2892_v32 = vcombine.high %v2866_v17, %v2874_v18  ;;  %v2908_v31 = vcombine.high %v2882_v19, %v2890_v21 }
 0x6ba   : > { %v2823_v35 = vcombine.low %v2799_v24, %v2815_v11  ;;  %v2824_v36 = vcombine.high %v2799_v24, %v2815_v11  ;;  %v2839_v39 = vcombine.low %v2806_v23, %v2822_v15  ;;  %v2840_v27 = vcombine.high %v2806_v23, %v2822_v15 }
 0x6bb   : > { %v2899_v43 = vrot.slane %v2891_v25, %v4509_v9  ;;  %v2915_v40 = vrot.slane %v2907_v29, %v4509_v9  ;;  %v2906_v46 = vrot.slane %v2892_v32, %v4509_v9  ;;  %v2922_v47 = vrot.slane %v2908_v31, %v4509_v9 }
 0x6bc   : > { %v2831_v42 = vrot.slane %v2823_v35, %v4509_v9  ;;  %v2838_v56 = vrot.slane %v2824_v36, %v4509_v9  ;;  %v2847_v54 = vrot.slane %v2839_v39, %v4509_v9  ;;  %v2854_v44 = vrot.slane %v2840_v27, %v4509_v9 }
 0x6bd   : > { %v2924_v28 = vcombine.high %v2899_v43, %v2915_v40  ;;  %v2923_v33 = vcombine.low %v2899_v43, %v2915_v40  ;;  %v2925_v53 = vcombine.low %v2906_v46, %v2922_v47  ;;  %v2926_v62 = vcombine.high %v2906_v46, %v2922_v47 }
 0x6be   : > { %v2927_v48 = vcombine.low %v2831_v42, %v2838_v56  ;;  %v3369_v49 = vcombine.high %v2831_v42, %v2838_v56  ;;  %v2943_v5 = vcombine.low %v2847_v54, %v2854_v44  ;;  %v3370_v50 = vcombine.high %v2847_v54, %v2854_v44 }
 0x6bf   : > { %2997 = vrot.lane.b32.xlu0 %v2924_v28, %s4109_s6 }
 0x6c0   : > { %v2934_v34 = vrot.slane %v2927_v48, %v4507_v2  ;;  %v2942_v26 = vrot.slane %v3369_v49, %v4507_v2  ;;  %v2950_v51 = vrot.slane %v2943_v5, %v4507_v2  ;;  %v2958_v52 = vrot.slane %v3370_v50, %v4507_v2 }
 0x6c2   : > { %v2959_v55 = vcombine.low %v2934_v34, %v2942_v26  ;;  %v2975_v57 = vcombine.low %v2950_v51, %v2958_v52  ;;  %v2960_v58 = vcombine.high %v2934_v34, %v2942_v26  ;;  %v2976_v59 = vcombine.high %v2950_v51, %v2958_v52 }
 0x6c3   : > { %3005 = vrot.lane.b32.xlu0 %v2925_v53, %s4110_s26 }
 0x6c4   : > { %v2967_v60 = vrot.slane %v2959_v55, %v4509_v9  ;;  %v2983_v61 = vrot.slane %v2975_v57, %v4509_v9  ;;  %v2974_v13 = vrot.slane %v2960_v58, %v4509_v9  ;;  %v2990_v2 = vrot.slane %v2976_v59, %v4509_v9 }
 0x6c6   : > { %v2992_v63 = vcombine.high %v2967_v60, %v2983_v61  ;;  %v2991_v20 = vcombine.low %v2967_v60, %v2983_v61  ;;  %v2993_v22 = vcombine.low %v2974_v13, %v2990_v2  ;;  %v2994_v1 = vcombine.high %v2974_v13, %v2990_v2 }
 0x6c7   : > { %3013 = vrot.lane.b32.xlu0 %v2926_v62, %s4111_s23 }
 0x6c8   : > { %2999 = vrot.lane.b32.xlu1 %v2992_v63, %s4109_s6 }
 0x6cc   : > { %3007 = vrot.lane.b32.xlu1 %v2993_v22, %s4110_s26 }
 0x6d0   : > { %3015 = vrot.lane.b32.xlu1 %v2994_v1, %s4111_s23 }
 0x731   : > { %v2998_v0 = vpop.permute.xlu0 %2997 }
 0x732   : > { %v3019_v7 = vsel %vm1708_vm4, %v2923_v33, %v2998_v0 }
 0x735   : > { %v3006_v4 = vpop.permute.xlu0 %3005 }
 0x736   : > { %v3021_v8 = vsel %vm2065_vm5, %v3019_v7, %v3006_v4 }
 0x739   : > { %v3014_v12 = vpop.permute.xlu0 %3013 }
 0x73a   : > { %v3000_v45 = vpop.permute.xlu1 %2999  ;;  %v3024_v9 = vsel %vm3023_vm7, %v3021_v8, %v3014_v12 }
 0x73b   : > { %3533 = vmatprep.mubr.msk.f32.mxu0 %vm948_vm3, %v3024_v9  ;;  %v3020_v10 = vsel %vm1708_vm4, %v2991_v20, %v3000_v45 }
 0x73e   : > { %v3008_v3 = vpop.permute.xlu1 %3007 }
 0x73f   : > { %v3022_v6 = vsel %vm2065_vm5, %v3020_v10, %v3008_v3 }
 0x742   : > { %v3016_v11 = vpop.permute.xlu1 %3015 }
 0x743   : > { %v3025_v15 = vsel %vm3023_vm7, %v3022_v6, %v3016_v11 }
 0x744   : > { %3534 = vmatmul.mubr.msk.f32.vlgmr.msra.gmra.mxu0 %vm948_vm3, %v3025_v15 }
 0x804   : > { %v3535_v16 = vpop.f32.mrf.mxu0 }
 0x805   : > { %v3115_v17 = vadd.f32 %v3535_v16, %v3371_v14 }
 0x806   : > { %v3109_v18 = vpop.f32.mrf.mxu0 }
 0x807   : > { %3119 = vst.msk [vmem:[%s4448_s13 + $0x8] sm:$0xff] %vm948_vm3, %v3115_v17  ;;  %v3110_v19 = vadd.f32 %v3371_v14, %v3109_v18 }
 0x809   : > { %3118 = vst.msk [vmem:[%s4448_s13] sm:$0xff] %vm948_vm3, %v3110_v19 }
 0x80a PF: > { %s4960_s29 = sld [smem:[#allocation26_spill]]  ;;  %s3136_s27 = sshll.u32 %s4448_s13, 4  ;;  %s4803_s27 = int_to_ptr.vmem [resolvable:$true] %s3136_s27 }
 0x80b   : > { %s4961_s11 = sld [smem:[#allocation27_spill]]  ;;  %s3121_s26 = scalar_lea.sflag [#allocation8], %s4417_s12 }
 0x80c   : > { %s4963_s10 = sld [smem:[#allocation42_spill]]  ;;  %s3933_s23 = scalar_lea.vmem %s4803_s27, 256 }
 0x80d   : > { %p3934_p3 = scmp.ne.s32.totalorder %s4803_s27, %s3933_s23  ;;  %s4112_s30 = smov [#allocation17]  }
 0x80e   : > { %s3937_s13 = sshll.u32 %s4112_s30, 4  ;;  %s3938_s13 = int_to_ptr.vmem [resolvable:$false] %s3937_s13 }
 0x80f   : > { %p3935_p0 = pnand %p3934_p3, %p4342_p10  ;;  %s3939_s5 = scalar_lea.vmem %s3938_s13, 512 }
 0x810   : > { %s3375_s7 = sshll.u32 %s4960_s29, 1  ;;  %p3940_p12 = scmp.lt.s32.totalorder %s4803_s27, %s3938_s13 }
 0x811   : > { %s3376_s19 = sshll.u32 %s4961_s11, 2  ;;  %p3936_p4 = pneg %p3935_p0 }
 0x812   : > { %s3133_s28 = sadd.s32 %s3376_s19, %s3375_s7  ;;  %p3941_p6 = scmp.lt.s32.totalorder %s3939_s5, %s3933_s23 }
 0x813   : > { %s3377_s16 = sshll.u32 %s3133_s28, 7 }
 0x814   : > { %s4808_s6 = scalar_lea.hbm %s4963_s10, %s3377_s16  ;;  %p3942_p11 = por %p3941_p6, %p3940_p12 }
 0x816   : > { %p3943_p13 = pnand %p3942_p11, %p3936_p4 }
 0x818   : > { %3946 = shalt.err (!%p3943_p13)
}
 0x819   : > { %s3947_s8 = scalar_lea.hbm %s4808_s6, 256  ;;  %s3951_s7 = scalar_lea.hbm %s4963_s10, 1024 }
 0x81a   : > { %p3948_p8 = scmp.ne.s32.totalorder %s4808_s6, %s3947_s8  ;;  %p3952_p5 = scmp.lt.s32.totalorder %s4808_s6, %s4963_s10 }
 0x81b   : > { %p3953_p9 = scmp.lt.s32.totalorder %s3951_s7, %s3947_s8 }
 0x81c   : > { %p3949_p2 = pnand %p3948_p8, %p4342_p10 }
 0x81d   : > { %p3954_p3 = por %p3953_p9, %p3952_p5 }
 0x81e   : > { %p3950_p7 = pneg %p3949_p2 }
 0x820   : > { %p3955_p0 = pnand %p3954_p3, %p3950_p7 }
 0x822   : > { %3958 = shalt.err (!%p3955_p0)
}
 0x823   : > { %s4113_s16 = smov 128   ;;  %s4114_s4 = smov 8  }
 0x824   : > { %3556 = dma.vmem_to_hbm [thread:$0]  (%p4342_p10), %s4803_s27, 256, %s4808_s6, %s3121_s26, %s4113_s16, %s4113_s16, %s4114_s4  }
 0x825 PF: > { %s4964_s9 = sld [smem:[#allocation24_spill]]  ;;  %p3591_p4 = scmp.ge.s32.totalorder %s4085_s25, 2 }
 0x827   : > { %p3579_p12 = pnand %p3591_p4, %p4353_p1 }
 0x829   : > { %p3580_p6 = pneg %p3579_p12 }
 0x82b   : > { %s3151_s23 = sand.u32 1, %s4964_s9  }
 0x82c   : > { %s3152_s30 = scalar_lea.sflag [#allocation8], %s3151_s23 }
 0x82d   : > { %4032 = dma.done.wait (%p3580_p6), %s3152_s30, 256  }
 0x82e   : > { %4034 = vsyncadd (%p3580_p6), %s3152_s30, 4294967040  ;;  %s31_s25 = sadd.s32 1, %s4085_s25   ;;  %s4966_s12 = sld [smem:[#allocation28_spill]] }
 0x82f   : > { %p4838_p11 = scmp.ge.s32.totalorder %s31_s25, 10   ;;  %s4967_s2 = sld [smem:[#allocation30_spill]] }
 0x830   : > { %s4968_s23 = sld [smem:[#allocation31_spill]]  ;;  %s4971_s13 = smov %s4041_s14 }
 0x831   : > { %s4969_s27 = sld [smem:[#allocation33_spill]]  ;;  %s4972_s14 = smov %s4045_s15 }
 0x832   : > { %s4973_s15 = smov %s4392_s3  ;;  %s4974_s16 = smov %s4053_s17 }
 0x833   : > { %s4975_s17 = smov %s4057_s18  ;;  %s4976_s18 = smov %s4364_s20 }
 0x834   : > { %s4977_s19 = smov %s4073_s22  ;;  %s4978_s20 = smov %s4966_s12 }
 0x835   : > { %s4979_s21 = smov %s4081_s24  ;;  %s4980_s22 = smov %s4967_s2 }
 0x836   :  { %30 = sbr.rel (!%p4838_p11) target bundleno = 24 (0x18), region = 142 }
 0x837   : > { %s4981_s24 = smov %s4969_s27 }
 0x83b   :  { %3157 = vsyncpa [#allocation7], 1 }
 0x83c   :  { %3159 = vsyncpa [#allocation7 + $0x1], 1 }
 0x83d   :  { %3160 = vsyncpa [#allocation10], 1 }
 0x83e   :  { %3162 = vsyncpa [#allocation10 + $0x1], 1 }
 0x83f   :  { %3163 = vsyncpa [#allocation13], 1 }
 0x840   :  { %3164 = vsyncpa [#allocation16], 1 }
 0x841   :  { %3165 = vsyncpa [#allocation8], 1 }
 0x842   :  { %3167 = vsyncpa [#allocation8 + $0x1], 1 }

</bundles_post_ra>
